<compile_context>
chip_gen: v7x
topology: tpu7x:2x2x1
jax: 0.10.0
libtpu: 0.0.40
codegen_flags: <defaults>
</compile_context>

<pallas_src>
import functools
import math

import jax
import jax.numpy as jnp
from jax import lax
from jax.experimental import pallas as pl
from jax.experimental.pallas import tpu as pltpu

EPS = 1e-5  # torch.nn.LayerNorm default eps


def _default_vmem_limit_bytes():
    """Generation-aware scoped-VMEM limit: ~half of physical, clamped to [32, 96] MiB.

    v5e/v6e (128 MiB physical) -> 64 MiB; v7x (64 MiB physical) -> 32 MiB.
    Falls back to a conservative 32 MiB if the hardware query is unavailable.
    """
    try:
        phys = int(pltpu.get_tpu_info().vmem_capacity_bytes)
    except Exception:
        phys = 64 * 1024 * 1024
    return int(min(96 * 1024 * 1024, max(32 * 1024 * 1024, phys // 2)))


# ------------------- standalone LayerNorm kernel (generic fn path) -----------------
def _layernorm_kernel(x_ref, g_ref, b_ref, o_ref):
    x = x_ref[...].astype(jnp.float32)                       # (TR, D)
    mean = jnp.mean(x, axis=-1, keepdims=True)
    xc = x - mean
    var = jnp.mean(xc * xc, axis=-1, keepdims=True)
    y = xc * lax.rsqrt(var + EPS)
    o_ref[...] = (y * g_ref[...].astype(jnp.float32)
                  + b_ref[...].astype(jnp.float32)).astype(o_ref.dtype)


def layernorm_pallas(x, gamma, beta, *, max_block_rows=1024, vmem_limit_bytes=None):
    """LayerNorm over the last dim of x (any leading shape).

    Used only on the generic (non-fused) PreNorm path.  The row tile is derived from
    the actual VMEM limit (2x input + 2x output double-buffered tiles; gamma/beta are
    negligible).  Non-divisible row counts use a cdiv grid; the ragged tail relies on
    Pallas dropping out-of-bounds output rows (all math here is strictly row-local).
    """
    *lead, D = x.shape
    rows = math.prod(lead) if lead else 1
    x2 = x.reshape(rows, D)
    g2 = gamma.reshape(1, D)
    b2 = beta.reshape(1, D)

    if vmem_limit_bytes is None:
        vmem_limit_bytes = _default_vmem_limit_bytes()

    itemsize = jnp.dtype(x.dtype).itemsize
    budget = int(vmem_limit_bytes * 0.75)             # headroom for compiler scratch
    rows_fit = max(8, budget // (4 * D * itemsize))   # 2x in + 2x out resident tiles
    block_rows = int(min(max_block_rows, rows_fit))
    block_rows = max(8, (block_rows // 8) * 8)
    if block_rows >= rows:
        block_rows = rows        # one block covering the full row dim (always legal)
    grid = (pl.cdiv(rows, block_rows),)

    out = pl.pallas_call(
        _layernorm_kernel,
        out_shape=jax.ShapeDtypeStruct((rows, D), x.dtype),
        grid_spec=pltpu.PrefetchScalarGridSpec(
            num_scalar_prefetch=0,
            grid=grid,
            in_specs=[
                pl.BlockSpec((block_rows, D), lambda i: (i, 0)),
                pl.BlockSpec((1, D), lambda i: (0, 0)),
                pl.BlockSpec((1, D), lambda i: (0, 0)),
            ],
            out_specs=pl.BlockSpec((block_rows, D), lambda i: (i, 0)),
        ),
        compiler_params=pltpu.CompilerParams(
            dimension_semantics=("parallel",),
            vmem_limit_bytes=int(vmem_limit_bytes),
        ),
    )(x2, g2, b2)
    return out.reshape(x.shape)


# --------------- fused kernel: LayerNorm(x), LayerNorm(y) + cross-attention ---------
def _prenorm_ca_kernel(x_ref, y_ref, g_ref, b_ref,
                       wq_ref, wk_ref, wv_ref, wo_ref, o_ref,
                       k_sc, v_sc, *, scale):
    g = g_ref[...].astype(jnp.float32)            # (1, D)
    b = b_ref[...].astype(jnp.float32)            # (1, D)
    cd = wq_ref.dtype                             # MXU operand dtype (f32 or bf16)

    def _ln(v):                                   # LayerNorm over last dim, f32 math
        vf = v.astype(jnp.float32)
        mean = jnp.mean(vf, axis=-1, keepdims=True)
        vc = vf - mean
        var = jnp.mean(vc * vc, axis=-1, keepdims=True)
        return vc * lax.rsqrt(var + EPS) * g + b

    # Hoist: LN(y) + K/V projections computed once per batch element (first query
    # tile) and kept resident in VMEM scratch across all query tiles (qi "arbitrary").
    @pl.when(pl.program_id(1) == 0)
    def _():
        ny = _ln(y_ref[...]).astype(cd)                                   # (Ny, D)
        k_sc[...] = jnp.dot(ny, wk_ref[...],
                            preferred_element_type=jnp.float32).astype(k_sc.dtype)
        v_sc[...] = jnp.dot(ny, wv_ref[...],
                            preferred_element_type=jnp.float32).astype(v_sc.dtype)

    nx = _ln(x_ref[...]).astype(cd)                                       # (TQ, D)
    # 1/sqrt(D) folded into q (TQ*D mults) instead of the (TQ, Ny) score matrix.
    q = (jnp.dot(nx, wq_ref[...], preferred_element_type=jnp.float32)
         * scale).astype(cd)

    k = k_sc[...]
    v = v_sc[...]
    # Contract last dims directly -> no materialized K transpose before the MXU push.
    s = lax.dot_general(q, k, (((1,), (1,)), ((), ())),
                        preferred_element_type=jnp.float32)               # (TQ, Ny)
    s = s - jnp.max(s, axis=-1, keepdims=True)
    p = jnp.exp(s)
    inv = pl.reciprocal(jnp.sum(p, axis=-1, keepdims=True), approx=True)  # EUP slot
    p = (p * inv).astype(cd)

    av = jnp.dot(p, v, preferred_element_type=jnp.float32).astype(cd)     # (TQ, D)
    out = jnp.dot(av, wo_ref[...], preferred_element_type=jnp.float32)
    o_ref[...] = out.astype(o_ref.dtype)
    # TODO(synk): flash-style Ny tiling (kv grid axis + online softmax scratch) to drop
    # the (TQ, Ny) score buffer and full-Ny K/V residency for long-context y.


def prenorm_cross_attention_pallas(x, y, gamma, beta, wq, wk, wv, wo, *,
                                   max_q_rows=512, mxu_dtype=None,
                                   vmem_limit_bytes=None,
                                   single_buffer_constants=True):
    """Fused PreNorm_CA forward for a single-head cross-attention `fn`:
       softmax(LN(x)Wq (LN(y)Wk)^T / sqrt(D)) (LN(y)Wv) Wo   -- one pallas_call.

    max_q_rows: query-row tile cap (prefer 128 on v5e, 256-512 on v6e/v7x).
    mxu_dtype:  e.g. jnp.bfloat16 to run MXU operands in bf16 with f32 accumulation
                (LN/softmax math stays f32).  None keeps the model dtype.
    """
    B, Nx, D = x.shape
    By, Ny, Dy = y.shape
    assert By == B and Dy == D

    if vmem_limit_bytes is None:
        vmem_limit_bytes = _default_vmem_limit_bytes()

    # Query-row tile: full Nx when small, else an MXU-friendly multiple of 128/8.
    if Nx <= max_q_rows:
        tq = Nx
    else:
        tq = (max_q_rows // 128) * 128 if max_q_rows >= 128 else max(8, (max_q_rows // 8) * 8)
        tq = min(tq, Nx)
    grid = (B, pl.cdiv(Nx, tq))

    # Optional bf16 MXU operands (recommended on v5e/v6e for f32 models).
    if mxu_dtype is not None:
        wq, wk, wv, wo = (w.astype(mxu_dtype) for w in (wq, wk, wv, wo))
    cd = wq.dtype

    g2 = gamma.reshape(1, D)
    b2 = beta.reshape(1, D)
    scale = 1.0 / math.sqrt(D)
    kernel = functools.partial(_prenorm_ca_kernel, scale=scale)

    def _build(const_mode):
        def spec(shape, idx, const):
            if const and const_mode is not None:
                return pl.BlockSpec(shape, idx, pipeline_mode=const_mode)
            return pl.BlockSpec(shape, idx)

        return pl.pallas_call(
            kernel,
            out_shape=jax.ShapeDtypeStruct((B, Nx, D), x.dtype),
            grid_spec=pltpu.PrefetchScalarGridSpec(
                num_scalar_prefetch=0,
                grid=grid,
                in_specs=[
                    # leading batch dim squeezed (None) -> 2-D refs inside the kernel
                    spec((None, tq, D), lambda bi, qi: (bi, qi, 0), False),  # x
                    spec((None, Ny, D), lambda bi, qi: (bi, 0, 0), True),    # y (K/V src)
                    spec((1, D), lambda bi, qi: (0, 0), True),               # gamma
                    spec((1, D), lambda bi, qi: (0, 0), True),               # beta
                    spec((D, D), lambda bi, qi: (0, 0), True),               # wq
                    spec((D, D), lambda bi, qi: (0, 0), True),               # wk
                    spec((D, D), lambda bi, qi: (0, 0), True),               # wv
                    spec((D, D), lambda bi, qi: (0, 0), True),               # wo
                ],
                out_specs=pl.BlockSpec((None, tq, D), lambda bi, qi: (bi, qi, 0)),
                scratch_shapes=[
                    pltpu.VMEM((Ny, D), cd),   # K = LN(y) @ Wk, persists across qi
                    pltpu.VMEM((Ny, D), cd),   # V = LN(y) @ Wv, persists across qi
                ],
            ),
            compiler_params=pltpu.CompilerParams(
                # Batch axis is genuinely "parallel" (megacore on v7x when B >= 2);
                # the query axis must be "arbitrary" so the K/V scratch persists.
                dimension_semantics=("parallel", "arbitrary"),
                vmem_limit_bytes=int(vmem_limit_bytes),
            ),
        )

    if single_buffer_constants:
        try:
            # Single-buffer constant-index operands (weights / gamma / beta / y):
            # their block index never changes within a batch, so double-buffering
            # them only burns VMEM.
            return _build(pl.Buffered(1))(x, y, g2, b2, wq, wk, wv, wo)
        except Exception:
            pass  # pipeline_mode unsupported by this Pallas build -> default buffering
    return _build(None)(x, y, g2, b2, wq, wk, wv, wo)


# ---------------------------------- PreNorm_CA --------------------------------------
class PreNormCA:
    """JAX/Pallas equivalent of:
         def forward(self, x, y, **kwargs):
             return self.fn(self.norm(x), self.norm(y), **kwargs)
       with a single shared nn.LayerNorm(dim) applied to both x and y.

    If `fused_fn` is given it receives the *un-normalized* (x, y) plus (gamma, beta)
    and applies the shared LayerNorm inside one fused Pallas kernel (preferred path).
    Otherwise `fn` receives the outputs of the standalone Pallas LayerNorm kernel.
    """

    def __init__(self, dim, fn=None, fused_fn=None):
        # nn.LayerNorm(dim) init: weight = ones(dim), bias = zeros(dim)
        self.gamma = jnp.ones((dim,), jnp.float32)
        self.beta = jnp.zeros((dim,), jnp.float32)
        self.fn = fn
        self.fused_fn = fused_fn

    def __call__(self, x, y, **kwargs):
        if self.fused_fn is not None:
            return self.fused_fn(x, y, self.gamma, self.beta, **kwargs)
        # TODO(synk): `fn` is an arbitrary injected nn.Module in PyTorch; the generic
        # path only fuses the LayerNorms and leaves `fn` to the caller.
        nx = layernorm_pallas(x, self.gamma, self.beta)
        ny = layernorm_pallas(y, self.gamma, self.beta)
        return self.fn(nx, ny, **kwargs)


# ------------------------------- reference (pure JAX) --------------------------------
def _layernorm_ref(x, gamma, beta):
    mean = jnp.mean(x, axis=-1, keepdims=True)
    var = jnp.mean((x - mean) ** 2, axis=-1, keepdims=True)
    return (x - mean) / jnp.sqrt(var + EPS) * gamma + beta


def _cross_attn_ref(nx, ny, wq, wk, wv, wo):
    q = nx @ wq
    k = ny @ wk
    v = ny @ wv
    s = jnp.einsum("bqd,bkd->bqk", q, k) / jnp.sqrt(jnp.float32(q.shape[-1]))
    p = jax.nn.softmax(s, axis=-1)
    return jnp.einsum("bqk,bkd->bqd", p, v) @ wo


if __name__ == "__main__":
    # D = 128 keeps output stores lane-dense (full 128-lane vst); shapes stay small.
    B, Nx, Ny, D = 2, 32, 16, 128

    key = jax.random.PRNGKey(0)
    kx, ky, kq, kk, kv, ko = jax.random.split(key, 6)
    x = jax.random.normal(kx, (B, Nx, D), jnp.float32)
    y = jax.random.normal(ky, (B, Ny, D), jnp.float32)

    # deterministic cross-attention weights for the representative `fn`
    wq = jax.random.normal(kq, (D, D), jnp.float32) * 0.05
    wk = jax.random.normal(kk, (D, D), jnp.float32) * 0.05
    wv = jax.random.normal(kv, (D, D), jnp.float32) * 0.05
    wo = jax.random.normal(ko, (D, D), jnp.float32) * 0.05

    # max_q_rows=16 forces multiple query tiles per batch so the K/V hoist
    # (@pl.when(qi == 0) + persistent scratch) is actually exercised.
    fused_fn = functools.partial(prenorm_cross_attention_pallas,
                                 wq=wq, wk=wk, wv=wv, wo=wo, max_q_rows=16)
    module = PreNormCA(D, fused_fn=fused_fn)

    out = jax.block_until_ready(module(x, y))

    # correctness vs pure-JAX reference (approx reciprocal in softmax -> 2e-3 tol)
    nx_ref = _layernorm_ref(x, module.gamma, module.beta)
    ny_ref = _layernorm_ref(y, module.gamma, module.beta)
    ref = _cross_attn_ref(nx_ref, ny_ref, wq, wk, wv, wo)
    assert out.shape == (B, Nx, D)
    assert jnp.allclose(out, ref, rtol=2e-3, atol=2e-3), "fused PreNorm_CA mismatch"

    # standalone LayerNorm kernel (generic-fn fallback path) check
    nx_pallas = jax.block_until_ready(layernorm_pallas(x, module.gamma, module.beta))
    assert jnp.allclose(nx_pallas, nx_ref, rtol=1e-4, atol=1e-4), "LayerNorm mismatch"

    print("KERNEL_OK")
</pallas_src>

<mosaic_0001>
module attributes {stable_mosaic.version = 11 : i64} {
  func.func @_prenorm_ca_kernel(%arg0: i32, %arg1: i32, %arg2: memref<1x16x128xf32, #tpu.memory_space<vmem>>, %arg3: memref<1x16x128xf32, #tpu.memory_space<vmem>>, %arg4: memref<1x128xf32, #tpu.memory_space<vmem>>, %arg5: memref<1x128xf32, #tpu.memory_space<vmem>>, %arg6: memref<128x128xf32, #tpu.memory_space<vmem>>, %arg7: memref<128x128xf32, #tpu.memory_space<vmem>>, %arg8: memref<128x128xf32, #tpu.memory_space<vmem>>, %arg9: memref<128x128xf32, #tpu.memory_space<vmem>>, %arg10: memref<1x16x128xf32, #tpu.memory_space<vmem>>, %arg11: memref<16x128xf32, #tpu.memory_space<vmem>>, %arg12: memref<16x128xf32, #tpu.memory_space<vmem>>) attributes {dimension_semantics = [#tpu.dimension_semantics<parallel>, #tpu.dimension_semantics<arbitrary>], iteration_bounds = array<i64: 2, 2>, scalar_prefetch = 0 : i64, scratch_operands = 2 : i64, tpu.core_type = #tpu.core_type<tc>, window_params = [{transform_indices = @transform_0, window_bounds = array<i64: 1, 16, 128>}, {pipeline_mode = #tpu.pipeline_mode<synchronous>, transform_indices = @transform_1, window_bounds = array<i64: 1, 16, 128>}, {pipeline_mode = #tpu.pipeline_mode<synchronous>, transform_indices = @transform_2, window_bounds = array<i64: 1, 128>}, {pipeline_mode = #tpu.pipeline_mode<synchronous>, transform_indices = @transform_3, window_bounds = array<i64: 1, 128>}, {pipeline_mode = #tpu.pipeline_mode<synchronous>, transform_indices = @transform_4, window_bounds = array<i64: 128, 128>}, {pipeline_mode = #tpu.pipeline_mode<synchronous>, transform_indices = @transform_5, window_bounds = array<i64: 128, 128>}, {pipeline_mode = #tpu.pipeline_mode<synchronous>, transform_indices = @transform_6, window_bounds = array<i64: 128, 128>}, {pipeline_mode = #tpu.pipeline_mode<synchronous>, transform_indices = @transform_7, window_bounds = array<i64: 128, 128>}, {transform_indices = @transform_8, window_bounds = array<i64: 1, 16, 128>}]} {
    %c0 = arith.constant 0 : index
    %c0_0 = arith.constant 0 : index
    %0 = vector.load %arg4[%c0, %c0_0] : memref<1x128xf32, #tpu.memory_space<vmem>>, vector<1x128xf32>
    %c0_1 = arith.constant 0 : index
    %c0_2 = arith.constant 0 : index
    %1 = vector.load %arg5[%c0_1, %c0_2] : memref<1x128xf32, #tpu.memory_space<vmem>>, vector<1x128xf32>
    %c0_i32 = arith.constant 0 : i32
    %2 = arith.cmpi eq, %arg1, %c0_i32 : i32
    %3 = arith.extui %2 : i1 to i32
    %c0_i32_3 = arith.constant 0 : i32
    %4 = arith.cmpi ne, %3, %c0_i32_3 : i32
    scf.if %4 {
      %c0_29 = arith.constant 0 : index
      %c0_30 = arith.constant 0 : index
      %c0_31 = arith.constant 0 : index
      %50 = vector.load %arg3[%c0_29, %c0_30, %c0_31] : memref<1x16x128xf32, #tpu.memory_space<vmem>>, vector<1x16x128xf32>
      %51 = vector.shape_cast %50 : vector<1x16x128xf32> to vector<16x128xf32>
      %cst_32 = arith.constant dense<0.000000e+00> : vector<16xf32>
      %52 = vector.multi_reduction <add>, %51, %cst_32 [1] : vector<16x128xf32> to vector<16xf32>
      %53 = vector.shape_cast %52 : vector<16xf32> to vector<16x1xf32>
      %cst_33 = arith.constant 1.280000e+02 : f32
      %54 = vector.broadcast %cst_33 : f32 to vector<16x1xf32>
      %55 = arith.divf %53, %54 : vector<16x1xf32>
      %56 = vector.broadcast %55 : vector<16x1xf32> to vector<16x128xf32>
      %57 = arith.subf %51, %56 : vector<16x128xf32>
      %58 = arith.mulf %57, %57 : vector<16x128xf32>
      %cst_34 = arith.constant dense<0.000000e+00> : vector<16xf32>
      %59 = vector.multi_reduction <add>, %58, %cst_34 [1] : vector<16x128xf32> to vector<16xf32>
      %60 = vector.shape_cast %59 : vector<16xf32> to vector<16x1xf32>
      %cst_35 = arith.constant 1.280000e+02 : f32
      %61 = vector.broadcast %cst_35 : f32 to vector<16x1xf32>
      %62 = arith.divf %60, %61 : vector<16x1xf32>
      %cst_36 = arith.constant 9.99999974E-6 : f32
      %63 = vector.broadcast %cst_36 : f32 to vector<16x1xf32>
      %64 = arith.addf %62, %63 : vector<16x1xf32>
      %65 = math.rsqrt %64 : vector<16x1xf32>
      %66 = vector.broadcast %65 : vector<16x1xf32> to vector<16x128xf32>
      %67 = arith.mulf %57, %66 : vector<16x128xf32>
      %68 = vector.broadcast %0 : vector<1x128xf32> to vector<16x128xf32>
      %69 = arith.mulf %67, %68 : vector<16x128xf32>
      %70 = vector.broadcast %1 : vector<1x128xf32> to vector<16x128xf32>
      %71 = arith.addf %69, %70 : vector<16x128xf32>
      %c0_37 = arith.constant 0 : index
      %c0_38 = arith.constant 0 : index
      %72 = vector.load %arg7[%c0_37, %c0_38] : memref<128x128xf32, #tpu.memory_space<vmem>>, vector<128x128xf32>
      %cst_39 = arith.constant dense<0.000000e+00> : vector<16x128xf32>
      %73 = tpu.matmul %71, %72, %cst_39 {dimension_numbers = #tpu.dot_dimension_numbers<[1], [0], [0], [1], [0, 0, 1, 1], [], []>} : vector<16x128xf32>, vector<128x128xf32>, vector<16x128xf32> -> vector<16x128xf32>
      %c0_40 = arith.constant 0 : index
      %c0_41 = arith.constant 0 : index
      %74 = vector.load %arg11[%c0_40, %c0_41] : memref<16x128xf32, #tpu.memory_space<vmem>>, vector<16x128xf32>
      tpu.vector_store %arg11[%c0_40, %c0_41], %73 {strides = array<i32>} : memref<16x128xf32, #tpu.memory_space<vmem>>, vector<16x128xf32>,
      %c0_42 = arith.constant 0 : index
      %c0_43 = arith.constant 0 : index
      %75 = vector.load %arg8[%c0_42, %c0_43] : memref<128x128xf32, #tpu.memory_space<vmem>>, vector<128x128xf32>
      %cst_44 = arith.constant dense<0.000000e+00> : vector<16x128xf32>
      %76 = tpu.matmul %71, %75, %cst_44 {dimension_numbers = #tpu.dot_dimension_numbers<[1], [0], [0], [1], [0, 0, 1, 1], [], []>} : vector<16x128xf32>, vector<128x128xf32>, vector<16x128xf32> -> vector<16x128xf32>
      %c0_45 = arith.constant 0 : index
      %c0_46 = arith.constant 0 : index
      %77 = vector.load %arg12[%c0_45, %c0_46] : memref<16x128xf32, #tpu.memory_space<vmem>>, vector<16x128xf32>
      tpu.vector_store %arg12[%c0_45, %c0_46], %76 {strides = array<i32>} : memref<16x128xf32, #tpu.memory_space<vmem>>, vector<16x128xf32>,
    } else {
    }
    %c0_4 = arith.constant 0 : index
    %c0_5 = arith.constant 0 : index
    %c0_6 = arith.constant 0 : index
    %5 = vector.load %arg2[%c0_4, %c0_5, %c0_6] : memref<1x16x128xf32, #tpu.memory_space<vmem>>, vector<1x16x128xf32>
    %6 = vector.shape_cast %5 : vector<1x16x128xf32> to vector<16x128xf32>
    %cst = arith.constant dense<0.000000e+00> : vector<16xf32>
    %7 = vector.multi_reduction <add>, %6, %cst [1] : vector<16x128xf32> to vector<16xf32>
    %8 = vector.shape_cast %7 : vector<16xf32> to vector<16x1xf32>
    %cst_7 = arith.constant 1.280000e+02 : f32
    %9 = vector.broadcast %cst_7 : f32 to vector<16x1xf32>
    %10 = arith.divf %8, %9 : vector<16x1xf32>
    %11 = vector.broadcast %10 : vector<16x1xf32> to vector<16x128xf32>
    %12 = arith.subf %6, %11 : vector<16x128xf32>
    %13 = arith.mulf %12, %12 : vector<16x128xf32>
    %cst_8 = arith.constant dense<0.000000e+00> : vector<16xf32>
    %14 = vector.multi_reduction <add>, %13, %cst_8 [1] : vector<16x128xf32> to vector<16xf32>
    %15 = vector.shape_cast %14 : vector<16xf32> to vector<16x1xf32>
    %cst_9 = arith.constant 1.280000e+02 : f32
    %16 = vector.broadcast %cst_9 : f32 to vector<16x1xf32>
    %17 = arith.divf %15, %16 : vector<16x1xf32>
    %cst_10 = arith.constant 9.99999974E-6 : f32
    %18 = vector.broadcast %cst_10 : f32 to vector<16x1xf32>
    %19 = arith.addf %17, %18 : vector<16x1xf32>
    %20 = math.rsqrt %19 : vector<16x1xf32>
    %21 = vector.broadcast %20 : vector<16x1xf32> to vector<16x128xf32>
    %22 = arith.mulf %12, %21 : vector<16x128xf32>
    %23 = vector.broadcast %0 : vector<1x128xf32> to vector<16x128xf32>
    %24 = arith.mulf %22, %23 : vector<16x128xf32>
    %25 = vector.broadcast %1 : vector<1x128xf32> to vector<16x128xf32>
    %26 = arith.addf %24, %25 : vector<16x128xf32>
    %c0_11 = arith.constant 0 : index
    %c0_12 = arith.constant 0 : index
    %27 = vector.load %arg6[%c0_11, %c0_12] : memref<128x128xf32, #tpu.memory_space<vmem>>, vector<128x128xf32>
    %cst_13 = arith.constant dense<0.000000e+00> : vector<16x128xf32>
    %28 = tpu.matmul %26, %27, %cst_13 {dimension_numbers = #tpu.dot_dimension_numbers<[1], [0], [0], [1], [0, 0, 1, 1], [], []>} : vector<16x128xf32>, vector<128x128xf32>, vector<16x128xf32> -> vector<16x128xf32>
    %cst_14 = arith.constant 0.0883883461 : f32
    %29 = vector.broadcast %cst_14 : f32 to vector<16x128xf32>
    %30 = arith.mulf %28, %29 : vector<16x128xf32>
    %c0_15 = arith.constant 0 : index
    %c0_16 = arith.constant 0 : index
    %31 = vector.load %arg11[%c0_15, %c0_16] : memref<16x128xf32, #tpu.memory_space<vmem>>, vector<16x128xf32>
    %c0_17 = arith.constant 0 : index
    %c0_18 = arith.constant 0 : index
    %32 = vector.load %arg12[%c0_17, %c0_18] : memref<16x128xf32, #tpu.memory_space<vmem>>, vector<16x128xf32>
    %cst_19 = arith.constant dense<0.000000e+00> : vector<16x16xf32>
    %33 = tpu.matmul %30, %31, %cst_19 {dimension_numbers = #tpu.dot_dimension_numbers<[1], [1], [0], [0], [0, 0, 1, 0], [], []>} : vector<16x128xf32>, vector<16x128xf32>, vector<16x16xf32> -> vector<16x16xf32>
    %cst_20 = arith.constant dense<0xFF800000> : vector<16xf32>
    %34 = vector.multi_reduction <maximumf>, %33, %cst_20 [1] : vector<16x16xf32> to vector<16xf32>
    %35 = vector.shape_cast %34 : vector<16xf32> to vector<16x1xf32>
    %36 = vector.broadcast %35 : vector<16x1xf32> to vector<16x16xf32>
    %37 = arith.subf %33, %36 : vector<16x16xf32>
    %38 = math.exp %37 : vector<16x16xf32>
    %cst_21 = arith.constant dense<0.000000e+00> : vector<16xf32>
    %39 = vector.multi_reduction <add>, %38, %cst_21 [1] : vector<16x16xf32> to vector<16xf32>
    %40 = vector.shape_cast %39 : vector<16xf32> to vector<16x1xf32>
    %41 = tpu.reciprocal %40 {approx = true} : vector<16x1xf32> -> vector<16x1xf32>
    %42 = vector.broadcast %41 : vector<16x1xf32> to vector<16x16xf32>
    %43 = arith.mulf %38, %42 : vector<16x16xf32>
    %cst_22 = arith.constant dense<0.000000e+00> : vector<16x128xf32>
    %44 = tpu.matmul %43, %32, %cst_22 {dimension_numbers = #tpu.dot_dimension_numbers<[1], [0], [0], [1], [0, 0, 1, 1], [], []>} : vector<16x16xf32>, vector<16x128xf32>, vector<16x128xf32> -> vector<16x128xf32>
    %c0_23 = arith.constant 0 : index
    %c0_24 = arith.constant 0 : index
    %45 = vector.load %arg9[%c0_23, %c0_24] : memref<128x128xf32, #tpu.memory_space<vmem>>, vector<128x128xf32>
    %cst_25 = arith.constant dense<0.000000e+00> : vector<16x128xf32>
    %46 = tpu.matmul %44, %45, %cst_25 {dimension_numbers = #tpu.dot_dimension_numbers<[1], [0], [0], [1], [0, 0, 1, 1], [], []>} : vector<16x128xf32>, vector<128x128xf32>, vector<16x128xf32> -> vector<16x128xf32>
    %c0_26 = arith.constant 0 : index
    %c0_27 = arith.constant 0 : index
    %c0_28 = arith.constant 0 : index
    %47 = vector.load %arg10[%c0_26, %c0_27, %c0_28] : memref<1x16x128xf32, #tpu.memory_space<vmem>>, vector<1x16x128xf32>
    %48 = vector.shape_cast %47 : vector<1x16x128xf32> to vector<16x128xf32>
    %49 = vector.shape_cast %46 : vector<16x128xf32> to vector<1x16x128xf32>
    tpu.vector_store %arg10[%c0_26, %c0_27, %c0_28], %49 {strides = array<i32>} : memref<1x16x128xf32, #tpu.memory_space<vmem>>, vector<1x16x128xf32>,
    return
  }
  func.func @transform_0(%arg0: i32, %arg1: i32) -> (i32, i32, i32) {
    %c0_i32 = arith.constant 0 : i32
    %c0_i32_0 = arith.constant 0 : i32
    return %arg0, %arg1, %c0_i32 : i32, i32, i32
  }
  func.func @transform_1(%arg0: i32, %arg1: i32) -> (i32, i32, i32) {
    %c0_i32 = arith.constant 0 : i32
    %c0_i32_0 = arith.constant 0 : i32
    %c0_i32_1 = arith.constant 0 : i32
    return %arg0, %c0_i32, %c0_i32_0 : i32, i32, i32
  }
  func.func @transform_2(%arg0: i32, %arg1: i32) -> (i32, i32) {
    %c0_i32 = arith.constant 0 : i32
    %c0_i32_0 = arith.constant 0 : i32
    %c0_i32_1 = arith.constant 0 : i32
    return %c0_i32, %c0_i32_0 : i32, i32
  }
  func.func @transform_3(%arg0: i32, %arg1: i32) -> (i32, i32) {
    %c0_i32 = arith.constant 0 : i32
    %c0_i32_0 = arith.constant 0 : i32
    %c0_i32_1 = arith.constant 0 : i32
    return %c0_i32, %c0_i32_0 : i32, i32
  }
  func.func @transform_4(%arg0: i32, %arg1: i32) -> (i32, i32) {
    %c0_i32 = arith.constant 0 : i32
    %c0_i32_0 = arith.constant 0 : i32
    %c0_i32_1 = arith.constant 0 : i32
    return %c0_i32, %c0_i32_0 : i32, i32
  }
  func.func @transform_5(%arg0: i32, %arg1: i32) -> (i32, i32) {
    %c0_i32 = arith.constant 0 : i32
    %c0_i32_0 = arith.constant 0 : i32
    %c0_i32_1 = arith.constant 0 : i32
    return %c0_i32, %c0_i32_0 : i32, i32
  }
  func.func @transform_6(%arg0: i32, %arg1: i32) -> (i32, i32) {
    %c0_i32 = arith.constant 0 : i32
    %c0_i32_0 = arith.constant 0 : i32
    %c0_i32_1 = arith.constant 0 : i32
    return %c0_i32, %c0_i32_0 : i32, i32
  }
  func.func @transform_7(%arg0: i32, %arg1: i32) -> (i32, i32) {
    %c0_i32 = arith.constant 0 : i32
    %c0_i32_0 = arith.constant 0 : i32
    %c0_i32_1 = arith.constant 0 : i32
    return %c0_i32, %c0_i32_0 : i32, i32
  }
  func.func @transform_8(%arg0: i32, %arg1: i32) -> (i32, i32, i32) {
    %c0_i32 = arith.constant 0 : i32
    %c0_i32_0 = arith.constant 0 : i32
    return %arg0, %arg1, %c0_i32 : i32, i32, i32
  }
}

module attributes {stable_mosaic.version = 11 : i64} {
  func.func @_prenorm_ca_kernel(%arg0: i32, %arg1: i32, %arg2: memref<1x16x128xf32, #tpu.memory_space<vmem>>, %arg3: memref<1x16x128xf32, #tpu.memory_space<vmem>>, %arg4: memref<1x128xf32, #tpu.memory_space<vmem>>, %arg5: memref<1x128xf32, #tpu.memory_space<vmem>>, %arg6: memref<128x128xf32, #tpu.memory_space<vmem>>, %arg7: memref<128x128xf32, #tpu.memory_space<vmem>>, %arg8: memref<128x128xf32, #tpu.memory_space<vmem>>, %arg9: memref<128x128xf32, #tpu.memory_space<vmem>>, %arg10: memref<1x16x128xf32, #tpu.memory_space<vmem>>, %arg11: memref<16x128xf32, #tpu.memory_space<vmem>>, %arg12: memref<16x128xf32, #tpu.memory_space<vmem>>) attributes {dimension_semantics = [#tpu.dimension_semantics<parallel>, #tpu.dimension_semantics<arbitrary>], iteration_bounds = array<i64: 2, 2>, scalar_prefetch = 0 : i64, scratch_operands = 2 : i64, tpu.core_type = #tpu.core_type<tc>, window_params = [{transform_indices = @transform_0, window_bounds = array<i64: 1, 16, 128>}, {transform_indices = @transform_1, window_bounds = array<i64: 1, 16, 128>}, {pipeline_mode = #tpu.pipeline_mode<synchronous>, transform_indices = @transform_2, window_bounds = array<i64: 1, 128>}, {pipeline_mode = #tpu.pipeline_mode<synchronous>, transform_indices = @transform_3, window_bounds = array<i64: 1, 128>}, {pipeline_mode = #tpu.pipeline_mode<synchronous>, transform_indices = @transform_4, window_bounds = array<i64: 128, 128>}, {pipeline_mode = #tpu.pipeline_mode<synchronous>, transform_indices = @transform_5, window_bounds = array<i64: 128, 128>}, {pipeline_mode = #tpu.pipeline_mode<synchronous>, transform_indices = @transform_6, window_bounds = array<i64: 128, 128>}, {pipeline_mode = #tpu.pipeline_mode<synchronous>, transform_indices = @transform_7, window_bounds = array<i64: 128, 128>}, {transform_indices = @transform_8, window_bounds = array<i64: 1, 16, 128>}]} {
    %c0 = arith.constant 0 : index
    %c0_0 = arith.constant 0 : index
    %0 = vector.load %arg4[%c0, %c0_0] : memref<1x128xf32, #tpu.memory_space<vmem>>, vector<1x128xf32>
    %c0_1 = arith.constant 0 : index
    %c0_2 = arith.constant 0 : index
    %1 = vector.load %arg5[%c0_1, %c0_2] : memref<1x128xf32, #tpu.memory_space<vmem>>, vector<1x128xf32>
    %c0_i32 = arith.constant 0 : i32
    %2 = arith.cmpi eq, %arg1, %c0_i32 : i32
    %3 = arith.extui %2 : i1 to i32
    %c0_i32_3 = arith.constant 0 : i32
    %4 = arith.cmpi ne, %3, %c0_i32_3 : i32
    scf.if %4 {
      %c0_29 = arith.constant 0 : index
      %c0_30 = arith.constant 0 : index
      %c0_31 = arith.constant 0 : index
      %50 = vector.load %arg3[%c0_29, %c0_30, %c0_31] : memref<1x16x128xf32, #tpu.memory_space<vmem>>, vector<1x16x128xf32>
      %51 = vector.shape_cast %50 : vector<1x16x128xf32> to vector<16x128xf32>
      %cst_32 = arith.constant dense<0.000000e+00> : vector<16xf32>
      %52 = vector.multi_reduction <add>, %51, %cst_32 [1] : vector<16x128xf32> to vector<16xf32>
      %53 = vector.shape_cast %52 : vector<16xf32> to vector<16x1xf32>
      %cst_33 = arith.constant 1.280000e+02 : f32
      %54 = vector.broadcast %cst_33 : f32 to vector<16x1xf32>
      %55 = arith.divf %53, %54 : vector<16x1xf32>
      %56 = vector.broadcast %55 : vector<16x1xf32> to vector<16x128xf32>
      %57 = arith.subf %51, %56 : vector<16x128xf32>
      %58 = arith.mulf %57, %57 : vector<16x128xf32>
      %cst_34 = arith.constant dense<0.000000e+00> : vector<16xf32>
      %59 = vector.multi_reduction <add>, %58, %cst_34 [1] : vector<16x128xf32> to vector<16xf32>
      %60 = vector.shape_cast %59 : vector<16xf32> to vector<16x1xf32>
      %cst_35 = arith.constant 1.280000e+02 : f32
      %61 = vector.broadcast %cst_35 : f32 to vector<16x1xf32>
      %62 = arith.divf %60, %61 : vector<16x1xf32>
      %cst_36 = arith.constant 9.99999974E-6 : f32
      %63 = vector.broadcast %cst_36 : f32 to vector<16x1xf32>
      %64 = arith.addf %62, %63 : vector<16x1xf32>
      %65 = math.rsqrt %64 : vector<16x1xf32>
      %66 = vector.broadcast %65 : vector<16x1xf32> to vector<16x128xf32>
      %67 = arith.mulf %57, %66 : vector<16x128xf32>
      %68 = vector.broadcast %0 : vector<1x128xf32> to vector<16x128xf32>
      %69 = arith.mulf %67, %68 : vector<16x128xf32>
      %70 = vector.broadcast %1 : vector<1x128xf32> to vector<16x128xf32>
      %71 = arith.addf %69, %70 : vector<16x128xf32>
      %c0_37 = arith.constant 0 : index
      %c0_38 = arith.constant 0 : index
      %72 = vector.load %arg7[%c0_37, %c0_38] : memref<128x128xf32, #tpu.memory_space<vmem>>, vector<128x128xf32>
      %cst_39 = arith.constant dense<0.000000e+00> : vector<16x128xf32>
      %73 = tpu.matmul %71, %72, %cst_39 {dimension_numbers = #tpu.dot_dimension_numbers<[1], [0], [0], [1], [0, 0, 1, 1], [], []>} : vector<16x128xf32>, vector<128x128xf32>, vector<16x128xf32> -> vector<16x128xf32>
      %c0_40 = arith.constant 0 : index
      %c0_41 = arith.constant 0 : index
      %74 = vector.load %arg11[%c0_40, %c0_41] : memref<16x128xf32, #tpu.memory_space<vmem>>, vector<16x128xf32>
      tpu.vector_store %arg11[%c0_40, %c0_41], %73 {strides = array<i32>} : memref<16x128xf32, #tpu.memory_space<vmem>>, vector<16x128xf32>,
      %c0_42 = arith.constant 0 : index
      %c0_43 = arith.constant 0 : index
      %75 = vector.load %arg8[%c0_42, %c0_43] : memref<128x128xf32, #tpu.memory_space<vmem>>, vector<128x128xf32>
      %cst_44 = arith.constant dense<0.000000e+00> : vector<16x128xf32>
      %76 = tpu.matmul %71, %75, %cst_44 {dimension_numbers = #tpu.dot_dimension_numbers<[1], [0], [0], [1], [0, 0, 1, 1], [], []>} : vector<16x128xf32>, vector<128x128xf32>, vector<16x128xf32> -> vector<16x128xf32>
      %c0_45 = arith.constant 0 : index
      %c0_46 = arith.constant 0 : index
      %77 = vector.load %arg12[%c0_45, %c0_46] : memref<16x128xf32, #tpu.memory_space<vmem>>, vector<16x128xf32>
      tpu.vector_store %arg12[%c0_45, %c0_46], %76 {strides = array<i32>} : memref<16x128xf32, #tpu.memory_space<vmem>>, vector<16x128xf32>,
    } else {
    }
    %c0_4 = arith.constant 0 : index
    %c0_5 = arith.constant 0 : index
    %c0_6 = arith.constant 0 : index
    %5 = vector.load %arg2[%c0_4, %c0_5, %c0_6] : memref<1x16x128xf32, #tpu.memory_space<vmem>>, vector<1x16x128xf32>
    %6 = vector.shape_cast %5 : vector<1x16x128xf32> to vector<16x128xf32>
    %cst = arith.constant dense<0.000000e+00> : vector<16xf32>
    %7 = vector.multi_reduction <add>, %6, %cst [1] : vector<16x128xf32> to vector<16xf32>
    %8 = vector.shape_cast %7 : vector<16xf32> to vector<16x1xf32>
    %cst_7 = arith.constant 1.280000e+02 : f32
    %9 = vector.broadcast %cst_7 : f32 to vector<16x1xf32>
    %10 = arith.divf %8, %9 : vector<16x1xf32>
    %11 = vector.broadcast %10 : vector<16x1xf32> to vector<16x128xf32>
    %12 = arith.subf %6, %11 : vector<16x128xf32>
    %13 = arith.mulf %12, %12 : vector<16x128xf32>
    %cst_8 = arith.constant dense<0.000000e+00> : vector<16xf32>
    %14 = vector.multi_reduction <add>, %13, %cst_8 [1] : vector<16x128xf32> to vector<16xf32>
    %15 = vector.shape_cast %14 : vector<16xf32> to vector<16x1xf32>
    %cst_9 = arith.constant 1.280000e+02 : f32
    %16 = vector.broadcast %cst_9 : f32 to vector<16x1xf32>
    %17 = arith.divf %15, %16 : vector<16x1xf32>
    %cst_10 = arith.constant 9.99999974E-6 : f32
    %18 = vector.broadcast %cst_10 : f32 to vector<16x1xf32>
    %19 = arith.addf %17, %18 : vector<16x1xf32>
    %20 = math.rsqrt %19 : vector<16x1xf32>
    %21 = vector.broadcast %20 : vector<16x1xf32> to vector<16x128xf32>
    %22 = arith.mulf %12, %21 : vector<16x128xf32>
    %23 = vector.broadcast %0 : vector<1x128xf32> to vector<16x128xf32>
    %24 = arith.mulf %22, %23 : vector<16x128xf32>
    %25 = vector.broadcast %1 : vector<1x128xf32> to vector<16x128xf32>
    %26 = arith.addf %24, %25 : vector<16x128xf32>
    %c0_11 = arith.constant 0 : index
    %c0_12 = arith.constant 0 : index
    %27 = vector.load %arg6[%c0_11, %c0_12] : memref<128x128xf32, #tpu.memory_space<vmem>>, vector<128x128xf32>
    %cst_13 = arith.constant dense<0.000000e+00> : vector<16x128xf32>
    %28 = tpu.matmul %26, %27, %cst_13 {dimension_numbers = #tpu.dot_dimension_numbers<[1], [0], [0], [1], [0, 0, 1, 1], [], []>} : vector<16x128xf32>, vector<128x128xf32>, vector<16x128xf32> -> vector<16x128xf32>
    %cst_14 = arith.constant 0.0883883461 : f32
    %29 = vector.broadcast %cst_14 : f32 to vector<16x128xf32>
    %30 = arith.mulf %28, %29 : vector<16x128xf32>
    %c0_15 = arith.constant 0 : index
    %c0_16 = arith.constant 0 : index
    %31 = vector.load %arg11[%c0_15, %c0_16] : memref<16x128xf32, #tpu.memory_space<vmem>>, vector<16x128xf32>
    %c0_17 = arith.constant 0 : index
    %c0_18 = arith.constant 0 : index
    %32 = vector.load %arg12[%c0_17, %c0_18] : memref<16x128xf32, #tpu.memory_space<vmem>>, vector<16x128xf32>
    %cst_19 = arith.constant dense<0.000000e+00> : vector<16x16xf32>
    %33 = tpu.matmul %30, %31, %cst_19 {dimension_numbers = #tpu.dot_dimension_numbers<[1], [1], [0], [0], [0, 0, 1, 0], [], []>} : vector<16x128xf32>, vector<16x128xf32>, vector<16x16xf32> -> vector<16x16xf32>
    %cst_20 = arith.constant dense<0xFF800000> : vector<16xf32>
    %34 = vector.multi_reduction <maximumf>, %33, %cst_20 [1] : vector<16x16xf32> to vector<16xf32>
    %35 = vector.shape_cast %34 : vector<16xf32> to vector<16x1xf32>
    %36 = vector.broadcast %35 : vector<16x1xf32> to vector<16x16xf32>
    %37 = arith.subf %33, %36 : vector<16x16xf32>
    %38 = math.exp %37 : vector<16x16xf32>
    %cst_21 = arith.constant dense<0.000000e+00> : vector<16xf32>
    %39 = vector.multi_reduction <add>, %38, %cst_21 [1] : vector<16x16xf32> to vector<16xf32>
    %40 = vector.shape_cast %39 : vector<16xf32> to vector<16x1xf32>
    %41 = tpu.reciprocal %40 {approx = true} : vector<16x1xf32> -> vector<16x1xf32>
    %42 = vector.broadcast %41 : vector<16x1xf32> to vector<16x16xf32>
    %43 = arith.mulf %38, %42 : vector<16x16xf32>
    %cst_22 = arith.constant dense<0.000000e+00> : vector<16x128xf32>
    %44 = tpu.matmul %43, %32, %cst_22 {dimension_numbers = #tpu.dot_dimension_numbers<[1], [0], [0], [1], [0, 0, 1, 1], [], []>} : vector<16x16xf32>, vector<16x128xf32>, vector<16x128xf32> -> vector<16x128xf32>
    %c0_23 = arith.constant 0 : index
    %c0_24 = arith.constant 0 : index
    %45 = vector.load %arg9[%c0_23, %c0_24] : memref<128x128xf32, #tpu.memory_space<vmem>>, vector<128x128xf32>
    %cst_25 = arith.constant dense<0.000000e+00> : vector<16x128xf32>
    %46 = tpu.matmul %44, %45, %cst_25 {dimension_numbers = #tpu.dot_dimension_numbers<[1], [0], [0], [1], [0, 0, 1, 1], [], []>} : vector<16x128xf32>, vector<128x128xf32>, vector<16x128xf32> -> vector<16x128xf32>
    %c0_26 = arith.constant 0 : index
    %c0_27 = arith.constant 0 : index
    %c0_28 = arith.constant 0 : index
    %47 = vector.load %arg10[%c0_26, %c0_27, %c0_28] : memref<1x16x128xf32, #tpu.memory_space<vmem>>, vector<1x16x128xf32>
    %48 = vector.shape_cast %47 : vector<1x16x128xf32> to vector<16x128xf32>
    %49 = vector.shape_cast %46 : vector<16x128xf32> to vector<1x16x128xf32>
    tpu.vector_store %arg10[%c0_26, %c0_27, %c0_28], %49 {strides = array<i32>} : memref<1x16x128xf32, #tpu.memory_space<vmem>>, vector<1x16x128xf32>,
    return
  }
  func.func @transform_0(%arg0: i32, %arg1: i32) -> (i32, i32, i32) {
    %c0_i32 = arith.constant 0 : i32
    %c0_i32_0 = arith.constant 0 : i32
    return %arg0, %arg1, %c0_i32 : i32, i32, i32
  }
  func.func @transform_1(%arg0: i32, %arg1: i32) -> (i32, i32, i32) {
    %c0_i32 = arith.constant 0 : i32
    %c0_i32_0 = arith.constant 0 : i32
    %c0_i32_1 = arith.constant 0 : i32
    return %arg0, %c0_i32, %c0_i32_0 : i32, i32, i32
  }
  func.func @transform_2(%arg0: i32, %arg1: i32) -> (i32, i32) {
    %c0_i32 = arith.constant 0 : i32
    %c0_i32_0 = arith.constant 0 : i32
    %c0_i32_1 = arith.constant 0 : i32
    return %c0_i32, %c0_i32_0 : i32, i32
  }
  func.func @transform_3(%arg0: i32, %arg1: i32) -> (i32, i32) {
    %c0_i32 = arith.constant 0 : i32
    %c0_i32_0 = arith.constant 0 : i32
    %c0_i32_1 = arith.constant 0 : i32
    return %c0_i32, %c0_i32_0 : i32, i32
  }
  func.func @transform_4(%arg0: i32, %arg1: i32) -> (i32, i32) {
    %c0_i32 = arith.constant 0 : i32
    %c0_i32_0 = arith.constant 0 : i32
    %c0_i32_1 = arith.constant 0 : i32
    return %c0_i32, %c0_i32_0 : i32, i32
  }
  func.func @transform_5(%arg0: i32, %arg1: i32) -> (i32, i32) {
    %c0_i32 = arith.constant 0 : i32
    %c0_i32_0 = arith.constant 0 : i32
    %c0_i32_1 = arith.constant 0 : i32
    return %c0_i32, %c0_i32_0 : i32, i32
  }
  func.func @transform_6(%arg0: i32, %arg1: i32) -> (i32, i32) {
    %c0_i32 = arith.constant 0 : i32
    %c0_i32_0 = arith.constant 0 : i32
    %c0_i32_1 = arith.constant 0 : i32
    return %c0_i32, %c0_i32_0 : i32, i32
  }
  func.func @transform_7(%arg0: i32, %arg1: i32) -> (i32, i32) {
    %c0_i32 = arith.constant 0 : i32
    %c0_i32_0 = arith.constant 0 : i32
    %c0_i32_1 = arith.constant 0 : i32
    return %c0_i32, %c0_i32_0 : i32, i32
  }
  func.func @transform_8(%arg0: i32, %arg1: i32) -> (i32, i32, i32) {
    %c0_i32 = arith.constant 0 : i32
    %c0_i32_0 = arith.constant 0 : i32
    return %arg0, %arg1, %c0_i32 : i32, i32, i32
  }
}

</mosaic_0001>

<bundles_post_ra>
// kernel: tpu_custom_call.1
= control target key start
LH: loop header
LB: loop body
LE: loop exit
PB: predicated region body
PF: predicated region fallthrough
CT: control target
= control target key end

     0   :  { %s2616_s0 = inlined_call_operand.hbm [shape: f32[2,32,128], index: 0, kind: input, shape index: {}]   ;;  %s2617_s1 = inlined_call_operand.hbm [shape: f32[2,16,128], index: 1, kind: input, shape index: {}]   ;;  %s2618_s2 = inlined_call_operand.vmem [shape: f32[1,128], index: 2, kind: input, shape index: {}]   ;;  %s2619_s3 = inlined_call_operand.vmem [shape: f32[1,128], index: 3, kind: input, shape index: {}]   ;;  %s2620_s4 = inlined_call_operand.hbm [shape: f32[128,128], index: 4, kind: input, shape index: {}]   ;;  %s2621_s5 = inlined_call_operand.hbm [shape: f32[128,128], index: 5, kind: input, shape index: {}]   ;;  %s2622_s6 = inlined_call_operand.hbm [shape: f32[128,128], index: 6, kind: input, shape index: {}]   ;;  %s2623_s7 = inlined_call_operand.hbm [shape: f32[128,128], index: 7, kind: input, shape index: {}]   ;;  %s2624_s8 = inlined_call_operand.hbm [shape: f32[2,32,128], index: 8, kind: output, shape index: {}]  }
   0x1   :  { %2638 = sst [smem:[#allocation25_spill]] %s2617_s1 }
   0x2   :  { %2639 = sst [smem:[#allocation26_spill]] %s2618_s2 }
   0x3   :  { %2640 = sst [smem:[#allocation27_spill]] %s2619_s3 }
   0x4   :  { %2641 = sst [smem:[#allocation28_spill]] %s2620_s4 }
   0x5   :  { %2642 = sst [smem:[#allocation29_spill]] %s2621_s5 }
   0x6   :  { %2643 = sst [smem:[#allocation30_spill]] %s2622_s6 }
   0x7   :  { %2644 = sst [smem:[#allocation31_spill]] %s2623_s7 }
   0x8   :  { %2645 = sst [smem:[#allocation32_spill]] %s2624_s8 }
   0x9   :  { %13 = vsyncpa [#allocation5], 0 }
   0xa   :  { %15 = vsyncpa [#allocation5 + $0x1], 0 }
   0xb   :  { %16 = vsyncpa [#allocation8], 0 }
   0xc   :  { %17 = vsyncpa [#allocation11], 0 }
   0xd   :  { %18 = vsyncpa [#allocation14], 0 }
   0xe   :  { %19 = vsyncpa [#allocation6], 0 }
   0xf   :  { %21 = vsyncpa [#allocation6 + $0x1], 0  ;;  %s2162_s27 = smov 0   ;;  %s2164_s28 = smov 0  }
  0x10   :  { %s2166_s29 = smov 0   ;;  %s2168_s30 = smov 0  }
  0x11   :  { %s2170_s9 = smov 0   ;;  %s2172_s10 = smov 0  }
  0x12   :  { %s2174_s11 = smov 0   ;;  %s2176_s12 = smov 0  }
  0x13   :  { %s2178_s13 = smov 0   ;;  %s2180_s14 = smov 0  }
  0x14   :  { %s2182_s15 = smov 0  }
  0x15 LB: > { %2646 = sst [smem:[#allocation22_spill]] %s2068_s28  ;;  %s2625_s16 = sadd.s32 4294967295, %s2104_s15   ;;  %s2104_s15 = sphi %s2182_s15, %s27_s15   ;;  %s2100_s14 = sphi %s2180_s14, %s2692_s14   ;;  %s2096_s13 = sphi %s2178_s13, %s2691_s13   ;;  %s2092_s12 = sphi %s2176_s12, %s2690_s12   ;;  %s2088_s11 = sphi %s2174_s11, %s2689_s11   ;;  %s2084_s10 = sphi %s2172_s10, %s2688_s10   ;;  %s2080_s9 = sphi %s2170_s9, %s2687_s9   ;;  %s2076_s30 = sphi %s2168_s30, %s2686_s30   ;;  %s2072_s29 = sphi %s2166_s29, %s2685_s29   ;;  %s2068_s28 = sphi %s2164_s28, %s2684_s28   ;;  %s2064_s27 = sphi %s2162_s27, %s2683_s27  }
  0x16   : > { %2647 = sst [smem:[#allocation23_spill]] %s2088_s11  ;;  %p87_p0 = scmp.ne.s32.totalorder %s2068_s28, %s2064_s27 }
  0x17   : > { %2648 = sst [smem:[#allocation24_spill]] %s2092_s12  ;;  %p2219_p1 = scmp.eq.s32.totalorder %s2625_s16, 0 }
  0x18   : > { %p1226_p2 = scmp.ge.s32.totalorder %s2104_s15, 1  ;;  %p252_p3 = scmp.lt.s32.totalorder %s2104_s15, 5 }
  0x19   : > { %s2649_s17 = scalar_select %p2219_p1, 1, 0 }
  0x1a   : > { %s1254_s18 = sshll.u32 %s2092_s12, 8  ;;  %p2228_p4 = por %p87_p0, %p2219_p1 }
  0x1b   : > { %s2651_s1 = sld [smem:[#allocation25_spill]]  ;;  %p2237_p5 = pnand %p1226_p2, %p252_p3 }
  0x1c   : > { %s2650_s19 = scalar_select %p2228_p4, 1, 0 }
  0x1d   : > { %s2652_s23 = scalar_select %p2237_p5, 1, 0 }
  0x1e   : > { %s2106_s24 = smov [#allocation7]   ;;  %p1647_p6 = pneg %p2237_p5 }
  0x1f   : > { %s267_s25 = sshll.u32 %s2106_s24, 4  ;;  %s2243_s25 = int_to_ptr.vmem [resolvable:$true] %s267_s25 }
  0x20   : > { %p2247_p7 = pnand %p1647_p6, %p2228_p4  ;;  %p2253_p8 = pnand %p1647_p6, %p2219_p1 }
  0x21   : > { %s2235_s22 = scalar_lea.hbm %s2651_s1, %s1254_s18  ;;  %s2107_s18 = smov [#allocation10]  }
  0x22   : > { %s2654_s27 = scalar_select %p2253_p8, 1, 0 }
  0x23   : > { %s2257_s20 = sshll.u32 %s2107_s18, 4  ;;  %s1794_s21 = scalar_lea.hbm %s2235_s22, 256  ;;  %s300_s20 = int_to_ptr.vmem [resolvable:$true] %s2257_s20 }
  0x24   : > { %p1795_p9 = scmp.ne.s32.totalorder %s2235_s22, %s1794_s21  ;;  %p1796_p10 = pneg %p2247_p7 }
  0x25   : > { %s1799_s28 = scalar_lea.hbm %s2651_s1, 512  ;;  %p1800_p13 = scmp.lt.u32.totalorder %s2235_s22, %s2651_s1 }
  0x26   : > { %p1797_p11 = pnand %p1796_p10, %p1795_p9  ;;  %p1801_p0 = scmp.lt.u32.totalorder %s1799_s28, %s1794_s21 }
  0x27   : > { %p1803_p3 = scmp.lt.u32.totalorder %s1794_s21, %s2235_s22 }
  0x28   : > { %p1798_p12 = pneg %p1797_p11  ;;  %p1802_p2 = por %p1801_p0, %p1800_p13 }
  0x2a   : > { %p1804_p6 = por %p1803_p3, %p1802_p2 }
  0x2c   : > { %p1805_p4 = pnand %p1804_p6, %p1798_p12 }
  0x2e   : > { %1808 = shalt.err (!%p1805_p4)
}
  0x2f   : > { %s1809_s18 = scalar_lea.vmem %s2243_s25, 256  ;;  %p1817_p1 = scmp.lt.s32.totalorder %s2243_s25, %s2243_s25 }
  0x30   : > { %p1810_p9 = scmp.ne.s32.totalorder %s2243_s25, %s1809_s18  ;;  %p1818_p8 = scmp.lt.s32.totalorder %s1809_s18, %s1809_s18 }
  0x32   : > { %p1812_p11 = pnand %p1810_p9, %p1796_p10  ;;  %p1819_p0 = por %p1818_p8, %p1817_p1 }
  0x34   : > { %p1813_p5 = pneg %p1812_p11 }
  0x36   : > { %p1820_p13 = pnand %p1819_p0, %p1813_p5 }
  0x38   : > { %1823 = shalt.err (!%p1820_p13)
}
  0x39   : > { %s2635_s8 = smov 128   ;;  %s2636_s28 = smov 8  }
  0x3a   : > { %1650 = dma.hbm_to_vmem [thread:$0]  (!%p2247_p7), %s2235_s22, 256, %s2243_s25, [#allocation8], %s2635_s8, %s2635_s8, %s2636_s28  }
  0x3b   : > { %s2655_s5 = sld [smem:[#allocation29_spill]]  ;;  %p2656_p4 = scmp.ne.s32.totalorder %s2654_s27, 0 }
  0x3d   : > { %p2297_p5 = pneg %p2656_p4 }
  0x41   : > { %s1824_s21 = scalar_lea.hbm %s2655_s5, 2048 }
  0x42   : > { %p1825_p1 = scmp.ne.s32.totalorder %s2655_s5, %s1824_s21  ;;  %p1831_p7 = scmp.lt.u32.totalorder %s1824_s21, %s2655_s5 }
  0x44   : > { %p1827_p8 = pnand %p2297_p5, %p1825_p1 }
  0x46   : > { %p1828_p10 = pneg %p1827_p8 }
  0x48   : > { %p1833_p12 = pnand %p1831_p7, %p1828_p10 }
  0x4a   : > { %1836 = shalt.err (!%p1833_p12)
}
  0x4b   : > { %s1837_s25 = scalar_lea.vmem %s300_s20, 2048  ;;  %p1845_p9 = scmp.lt.s32.totalorder %s300_s20, %s300_s20 }
  0x4c   : > { %p1838_p2 = scmp.ne.s32.totalorder %s300_s20, %s1837_s25  ;;  %p1846_p11 = scmp.lt.s32.totalorder %s1837_s25, %s1837_s25 }
  0x4e   : > { %p1840_p3 = pnand %p1838_p2, %p2297_p5  ;;  %p1847_p0 = por %p1846_p11, %p1845_p9 }
  0x50   : > { %p1841_p6 = pneg %p1840_p3 }
  0x52   : > { %p1848_p13 = pnand %p1847_p0, %p1841_p6 }
  0x54   : > { %1851 = shalt.err (!%p1848_p13)
}
  0x55   : > { %1656 = dma.hbm_to_vmem [thread:$0]  (!%p2656_p4), %s2655_s5, 2048, %s300_s20, [#allocation11], %s2635_s8, %s2635_s8, %s2636_s28  }
  0x56   : > { %s2110_s21 = smov [#allocation9]   ;;  %s2111_s18 = smov [#allocation12]  }
  0x57   : > { %s286_s24 = sshll.u32 %s2110_s21, 4  ;;  %s312_s26 = sshll.u32 %s2111_s18, 4  ;;  %s287_s24 = int_to_ptr.vmem [resolvable:$true] %s286_s24  ;;  %s2316_s26 = int_to_ptr.vmem [resolvable:$true] %s312_s26 }
  0x58   : > { %s2658_s4 = sld [smem:[#allocation28_spill]] }
  0x5e   : > { %s1852_s11 = scalar_lea.hbm %s2658_s4, 2048 }
  0x5f   : > { %p1853_p1 = scmp.ne.s32.totalorder %s2658_s4, %s1852_s11  ;;  %p1859_p7 = scmp.lt.u32.totalorder %s1852_s11, %s2658_s4 }
  0x61   : > { %p1855_p8 = pnand %p1853_p1, %p2297_p5 }
  0x63   : > { %p1856_p10 = pneg %p1855_p8 }
  0x65   : > { %p1861_p12 = pnand %p1859_p7, %p1856_p10 }
  0x67   : > { %1864 = shalt.err (!%p1861_p12)
}
  0x68   : > { %s1865_s16 = scalar_lea.vmem %s287_s24, 2048  ;;  %p1873_p9 = scmp.lt.s32.totalorder %s287_s24, %s287_s24 }
  0x69   : > { %p1866_p2 = scmp.ne.s32.totalorder %s287_s24, %s1865_s16  ;;  %p1874_p11 = scmp.lt.s32.totalorder %s1865_s16, %s1865_s16 }
  0x6b   : > { %p1868_p3 = pnand %p1866_p2, %p2297_p5  ;;  %p1875_p0 = por %p1874_p11, %p1873_p9 }
  0x6d   : > { %p1869_p6 = pneg %p1868_p3 }
  0x6f   : > { %p1876_p13 = pnand %p1875_p0, %p1869_p6 }
  0x71   : > { %1879 = shalt.err (!%p1876_p13)
}
  0x72   : > { %1653 = dma.hbm_to_vmem [thread:$0]  (!%p2656_p4), %s2658_s4, 2048, %s287_s24, [#allocation8], %s2635_s8, %s2635_s8, %s2636_s28  }
  0x73   : > { %s2659_s6 = sld [smem:[#allocation30_spill]] }
  0x79   : > { %s1880_s18 = scalar_lea.hbm %s2659_s6, 2048 }
  0x7a   : > { %p1881_p1 = scmp.ne.s32.totalorder %s2659_s6, %s1880_s18  ;;  %p1887_p7 = scmp.lt.u32.totalorder %s1880_s18, %s2659_s6 }
  0x7c   : > { %p1883_p8 = pnand %p1881_p1, %p2297_p5 }
  0x7e   : > { %p1884_p10 = pneg %p1883_p8 }
  0x80   : > { %p1889_p12 = pnand %p1887_p7, %p1884_p10 }
  0x82   : > { %1892 = shalt.err (!%p1889_p12)
}
  0x83   : > { %s1893_s24 = scalar_lea.vmem %s2316_s26, 2048  ;;  %p1901_p9 = scmp.lt.s32.totalorder %s2316_s26, %s2316_s26 }
  0x84   : > { %p1894_p2 = scmp.ne.s32.totalorder %s2316_s26, %s1893_s24  ;;  %p1902_p11 = scmp.lt.s32.totalorder %s1893_s24, %s1893_s24 }
  0x86   : > { %p1896_p3 = pnand %p1894_p2, %p2297_p5  ;;  %p1903_p0 = por %p1902_p11, %p1901_p9 }
  0x88   : > { %p1897_p6 = pneg %p1896_p3 }
  0x8a   : > { %p1904_p13 = pnand %p1903_p0, %p1897_p6 }
  0x8c   : > { %1907 = shalt.err (!%p1904_p13)
}
  0x8d   : > { %1659 = dma.hbm_to_vmem [thread:$0]  (!%p2656_p4), %s2659_s6, 2048, %s2316_s26, [#allocation11], %s2635_s8, %s2635_s8, %s2636_s28  }
  0x8e   : > { %s2112_s3 = smov [#allocation13]   ;;  %s2660_s7 = sld [smem:[#allocation31_spill]] }
  0x8f   : > { %s325_s11 = sshll.u32 %s2112_s3, 4  ;;  %s326_s11 = int_to_ptr.vmem [resolvable:$true] %s325_s11 }
  0x94   : > { %s1908_s22 = scalar_lea.hbm %s2660_s7, 2048 }
  0x95   : > { %p1909_p1 = scmp.ne.s32.totalorder %s2660_s7, %s1908_s22  ;;  %p1915_p7 = scmp.lt.u32.totalorder %s1908_s22, %s2660_s7 }
  0x97   : > { %p1911_p8 = pnand %p1909_p1, %p2297_p5 }
  0x99   : > { %p1912_p10 = pneg %p1911_p8 }
  0x9b   : > { %p1917_p12 = pnand %p1915_p7, %p1912_p10 }
  0x9d   : > { %1920 = shalt.err (!%p1917_p12)
}
  0x9e   : > { %s1921_s26 = scalar_lea.vmem %s326_s11, 2048  ;;  %p1929_p9 = scmp.lt.s32.totalorder %s326_s11, %s326_s11 }
  0x9f   : > { %p1922_p2 = scmp.ne.s32.totalorder %s326_s11, %s1921_s26  ;;  %p1930_p11 = scmp.lt.s32.totalorder %s1921_s26, %s1921_s26 }
  0xa1   : > { %p1924_p3 = pnand %p1922_p2, %p2297_p5  ;;  %p1931_p0 = por %p1930_p11, %p1929_p9 }
  0xa3   : > { %p1925_p6 = pneg %p1924_p3 }
  0xa5   : > { %p1932_p13 = pnand %p1931_p0, %p1925_p6 }
  0xa7   : > { %1935 = shalt.err (!%p1932_p13)
}
  0xa8   : > { %1662 = dma.hbm_to_vmem [thread:$0]  (!%p2656_p4), %s2660_s7, 2048, %s326_s11, [#allocation14], %s2635_s8, %s2635_s8, %s2636_s28  }
  0xa9   : > { %s1225_s1 = sadd.s32 4294967294, %s2104_s15   ;;  %s36_s27 = sadd.s32 1, %s2096_s13 }
  0xaa   : > { %s39_s3 = sadd.s32 1, %s2100_s14  ;;  %p37_p5 = scmp.ge.s32.totalorder %s36_s27, 2 }
  0xab   : > { %s48_s21 = sadd.s32 1, %s2084_s10  ;;  %p55_p1 = scmp.ne.s32.totalorder %s2084_s10, %s2080_s9 }
  0xac   : > { %p56_p8 = scmp.eq.s32.totalorder %s2104_s15, 0  ;;  %s2694_s27 = smov (%p37_p5, %s36_s27), 0 }
  0xad   : > { %s2696_s3 = smov (!%p37_p5, %s39_s3), %s2100_s14  ;;  %s44_s18 = ssub.s32 %s2096_s13, %s2694_s27 }
  0xae   : > { %p2398_p10 = por %p56_p8, %p55_p1  ;;  %p41_p4 = scmp.ge.s32.totalorder %s2696_s3, 2 }
  0xaf   : > { %p61_p7 = scmp.ne.s32.totalorder %s2080_s9, %s2076_s30  ;;  %s74_s11 = sadd.s32 1, %s2072_s29 }
  0xb0   : > { %s2662_s25 = sadd.s32 4294967295, %s2104_s15   ;;  %s2698_s3 = smov (%p41_p4, %s2696_s3), 0 }
  0xb1   : > { %p239_p12 = scmp.eq.s32.totalorder %s2662_s25, 3  ;;  %p2663_p2 = scmp.ne.s32.totalorder %s2649_s17, 0 }
  0xb2   : > { %s43_s24 = ssub.s32 %s2100_s14, %s2698_s3  ;;  %p245_p9 = scmp.eq.s32.totalorder %s1225_s1, 3 }
  0xb3   : > { %p2411_p3 = por %p2663_p2, %p61_p7  ;;  %p2415_p6 = por %p239_p12, %p55_p1 }
  0xb4   : > { %s45_s26 = sor.u32 %s44_s18, %s43_s24  ;;  %p72_p11 = scmp.eq.s32.totalorder %s43_s24, 0 }
  0xb5   : > { %s2665_s20 = scalar_select %p2415_p6, 1, 0 }
  0xb6   : > { %p46_p0 = scmp.eq.s32.totalorder %s45_s26, 0  ;;  %p2421_p13 = por %p245_p9, %p61_p7 }
  0xb7   : > { %s2426_s2 = scalar_select %p72_p11, %s2072_s29, %s74_s11  }
  0xb8   : > { %s2666_s16 = scalar_select %p2421_p13, 1, 0 }
  0xb9   : > { %s2429_s25 = scalar_select %p46_p0, %s2084_s10, %s48_s21  }
  0xba   : > { %p1675_p5 = scmp.lt.s32.totalorder %s2104_s15, 4  ;;  %s339_s8 = sand.u32 1, %s2084_s10  }
  0xbb   : > { %s1234_s28 = sshll.u32 %s339_s8, 4  ;;  %s1235_s4 = sshll.u32 %s2096_s13, 1 }
  0xbc   : > { %s1236_s5 = sshll.u32 %s2100_s14, 2  ;;  %s343_s6 = scalar_lea.vmem [#allocation4], %s1234_s28 }
  0xbd   : > { %s352_s7 = sshll.u32 %s343_s6, 4  ;;  %s349_s1 = sadd.s32 %s1236_s5, %s1235_s4  ;;  %s2435_s7 = int_to_ptr.vmem [resolvable:$true] %s352_s7 }
  0xbe   : > { %s1237_s18 = sshll.u32 %s349_s1, 7  ;;  %p2439_p1 = pnand %p1675_p5, %p2398_p10 }
  0xbf   : > { %s2446_s21 = scalar_lea.hbm %s2616_s0, %s1237_s18  ;;  %s2448_s4 = scalar_lea.sflag [#allocation5], %s339_s8 }
  0xc0   : > { %s1936_s5 = scalar_lea.hbm %s2446_s21, 256  ;;  %p1938_p10 = pneg %p2439_p1 }
  0xc1   : > { %p1937_p8 = scmp.ne.s32.totalorder %s2446_s21, %s1936_s5  ;;  %s1941_s22 = scalar_lea.hbm %s2616_s0, 1024 }
  0xc2   : > { %p1942_p12 = scmp.lt.u32.totalorder %s2446_s21, %s2616_s0  ;;  %p1943_p2 = scmp.lt.u32.totalorder %s1941_s22, %s1936_s5 }
  0xc3   : > { %p1939_p4 = pnand %p1938_p10, %p1937_p8  ;;  %p1945_p11 = scmp.lt.u32.totalorder %s1936_s5, %s2446_s21 }
  0xc4   : > { %p1944_p9 = por %p1943_p2, %p1942_p12 }
  0xc5   : > { %p1940_p7 = pneg %p1939_p4 }
  0xc6   : > { %p1946_p0 = por %p1945_p11, %p1944_p9 }
  0xc8   : > { %p1947_p5 = pnand %p1946_p0, %p1940_p7 }
  0xca   : > { %1950 = shalt.err (!%p1947_p5)
}
  0xcb   : > { %s1951_s8 = scalar_lea.vmem %s2435_s7, 256  ;;  %s2113_s11 = smov [#allocation4]  }
  0xcc   : > { %p1952_p8 = scmp.ne.s32.totalorder %s2435_s7, %s1951_s8  ;;  %s1956_s26 = sshll.u32 %s2113_s11, 4  ;;  %s1957_s26 = int_to_ptr.vmem [resolvable:$false] %s1956_s26 }
  0xcd   : > { %s1958_s6 = scalar_lea.vmem %s1957_s26, 512  ;;  %p1959_p6 = scmp.lt.s32.totalorder %s2435_s7, %s1957_s26 }
  0xce   : > { %p1954_p4 = pnand %p1952_p8, %p1938_p10  ;;  %p1960_p12 = scmp.lt.s32.totalorder %s1958_s6, %s1951_s8 }
  0xd0   : > { %p1955_p13 = pneg %p1954_p4  ;;  %p1961_p2 = por %p1960_p12, %p1959_p6 }
  0xd2   : > { %p1962_p9 = pnand %p1961_p2, %p1955_p13 }
  0xd4   : > { %1965 = shalt.err (!%p1962_p9)
}
  0xd5   : > { %s2668_s5 = smov 8   ;;  %s2669_s28 = smov 128  }
  0xd6   : > { %1666 = dma.hbm_to_vmem [thread:$0]  (!%p2439_p1), %s2446_s21, 256, %s2435_s7, %s2448_s4, %s2669_s28, %s2669_s28, %s2668_s5  }
  0xd7   : > { %p2670_p10 = scmp.ne.s32.totalorder %s2652_s23, 0 }
  0xd8   : > { %s2482_s22 = sand.u32 (!%p2670_p10), 1, %s2080_s9  }
  0xd9   : > { %364 = sbr.rel (%p2670_p10) target bundleno = 2275 (0x8e3), region = 52  ;;  %s1239_s1 = sshll.u32 (!%p2670_p10), %s2482_s22, 4 }
  0xda   : > { %s367_s18 = scalar_lea.sflag (!%p2670_p10), [#allocation5], %s2482_s22  ;;  %s2486_s8 = scalar_lea.vmem (!%p2670_p10), [#allocation4], %s1239_s1 }
  0xe0   : > { %2039 = dma.done.wait (%p2411_p3), %s367_s18, 256  }
  0xe1   : > { %2041 = vsyncadd (%p2411_p3), %s367_s18, 4294967040  ;;  %p2671_p6 = scmp.ne.s32.totalorder %s2650_s19, 0 }
  0xe3   : > { %2043 = dma.done.wait (%p2671_p6), [#allocation8], 256  }
  0xe4   : > { %2045 = vsyncadd (%p2671_p6), [#allocation8], 4294967040  ;;  %p2672_p13 = scmp.ne.s32.totalorder %s2649_s17, 0 }
  0xe6   : > { %2047 = dma.done.wait (%p2672_p13), [#allocation8], 2048  }
  0xe7   : > { %2049 = vsyncadd (%p2672_p13), [#allocation8], 4294965248 }
  0xe8   : > { %2051 = dma.done.wait (%p2672_p13), [#allocation11], 4096  }
  0xe9   : > { %2053 = vsyncadd (%p2672_p13), [#allocation11], 4294963200 }
  0xea   : > { %2055 = dma.done.wait (%p2672_p13), [#allocation14], 2048  }
  0xeb   : > { %2057 = vsyncadd (%p2672_p13), [#allocation14], 4294965248  ;;  %s2673_s23 = sld [smem:[#allocation26_spill]]  ;;  %s2674_s21 = sld [smem:[#allocation27_spill]] }
  0xec   : > { %s2518_s4 = scalar_lea.vmem [#allocation15], %s1239_s1  ;;  %s2675_s11 = sld [smem:[#allocation23_spill]] }
  0xf1   : > { %v2511_v0 = vld [vmem:[%s2673_s23] sm:$0x1] }
  0xf2   : > { %v2516_v1 = vld [vmem:[%s2674_s21] sm:$0x1]  ;;  %p1245_p3 = scmp.ne.s32.totalorder %s2675_s11, 0 }
  0xf3   : > { %v431_v2 = vld [vmem:[#allocation7] sm:$0xff] (!%p1245_p3)  ;;  %v432_v3 = vld [vmem:[#allocation7 + $0x8] sm:$0xff] (!%p1245_p3)  ;;  %v472_v4 = vld [vmem:[#allocation10] sm:$0xff] (!%p1245_p3)  ;;  %v457_v62 = vlaneseq (!%p1245_p3) }
  0xf4   : > { %430 = sbr.rel (%p1245_p3) target bundleno = 773 (0x305), region = 80  ;;  %433 = vadd.xlane.f32.xlu0 (!%p1245_p3), %v431_v2  ;;  %v473_v5 = vld [vmem:[#allocation10 + $0x8] sm:$0xff] (!%p1245_p3)  ;;  %v565_v6 = vld [vmem:[#allocation12] sm:$0xff] (!%p1245_p3)  ;;  %v474_v9 = vld [vmem:[#allocation10 + $0x10] sm:$0xff] (!%p1245_p3) }
  0xf5   : > { %v1489_v7 = vpack.c.bf16 (!%p1245_p3), %v473_v5, %v472_v4  ;;  %v566_v8 = vld [vmem:[#allocation12 + $0x8] sm:$0xff] (!%p1245_p3)  ;;  %v475_v10 = vld [vmem:[#allocation10 + $0x18] sm:$0xff] (!%p1245_p3)  ;;  %v567_v13 = vld [vmem:[#allocation12 + $0x10] sm:$0xff] (!%p1245_p3)  ;;  %v458_v4 = vshrl.u32 (!%p1245_p3), %v457_v62, 7 }
  0xf6   : > { %v1521_v11 = vpack.c.bf16 (!%p1245_p3), %v566_v8, %v565_v6  ;;  %v1493_v12 = vpack.c.bf16 (!%p1245_p3), %v475_v10, %v474_v9  ;;  %v568_v14 = vld [vmem:[#allocation12 + $0x18] sm:$0xff] (!%p1245_p3)  ;;  %v476_v24 = vld [vmem:[#allocation10 + $0x20] sm:$0xff] (!%p1245_p3)  ;;  %v477_v25 = vld [vmem:[#allocation10 + $0x28] sm:$0xff] (!%p1245_p3) }
  0xf7   : > { %1490 = vmatprep.subr.bf16.mxu0 (!%p1245_p3), %v1489_v7  ;;  %v1525_v15 = vpack.c.bf16 (!%p1245_p3), %v568_v14, %v567_v13  ;;  %v569_v26 = vld [vmem:[#allocation12 + $0x20] sm:$0xff] (!%p1245_p3)  ;;  %v1497_v27 = vpack.c.bf16 (!%p1245_p3), %v477_v25, %v476_v24  ;;  %v570_v28 = vld [vmem:[#allocation12 + $0x28] sm:$0xff] (!%p1245_p3)  ;;  %v478_v30 = vld [vmem:[#allocation10 + $0x30] sm:$0xff] (!%p1245_p3)  ;;  %v459_v6 = vsub.s32 (!%p1245_p3), 0, %v458_v4 }
  0xf8   : > { %435 = vadd.xlane.f32.xlu0 (!%p1245_p3), %v432_v3  ;;  %1522 = vmatprep.subr.bf16.mxu1 (!%p1245_p3), %v1521_v11  ;;  %v1529_v29 = vpack.c.bf16 (!%p1245_p3), %v570_v28, %v569_v26  ;;  %v479_v31 = vld [vmem:[#allocation10 + $0x38] sm:$0xff] (!%p1245_p3)  ;;  %v571_v32 = vld [vmem:[#allocation12 + $0x30] sm:$0xff] (!%p1245_p3)  ;;  %v480_v36 = vld [vmem:[#allocation10 + $0x40] sm:$0xff] (!%p1245_p3) }
  0xf9   : > { %1492 = vmatpush3.bf16.msra.mxu0 (!%p1245_p3), %v1489_v7  ;;  %1524 = vmatpush3.bf16.msra.mxu1 (!%p1245_p3), %v1521_v11  ;;  %v1501_v33 = vpack.c.bf16 (!%p1245_p3), %v479_v31, %v478_v30  ;;  %v572_v34 = vld [vmem:[#allocation12 + $0x38] sm:$0xff] (!%p1245_p3)  ;;  %v481_v37 = vld [vmem:[#allocation10 + $0x48] sm:$0xff] (!%p1245_p3)  ;;  %v573_v38 = vld [vmem:[#allocation12 + $0x40] sm:$0xff] (!%p1245_p3)  ;;  %v460_v7 = vrot.slane (!%p1245_p3), %v2511_v0, %v459_v6  ;;  %v468_v10 = vrot.slane (!%p1245_p3), %v2516_v1, %v459_v6 }
  0xfa   : > { %1494 = vmatprep.subr.bf16.mxu0 (!%p1245_p3), %v1493_v12  ;;  %1526 = vmatprep.subr.bf16.mxu1 (!%p1245_p3), %v1525_v15  ;;  %v1533_v35 = vpack.c.bf16 (!%p1245_p3), %v572_v34, %v571_v32  ;;  %v1505_v39 = vpack.c.bf16 (!%p1245_p3), %v481_v37, %v480_v36  ;;  %v574_v40 = vld [vmem:[#allocation12 + $0x48] sm:$0xff] (!%p1245_p3)  ;;  %v482_v42 = vld [vmem:[#allocation10 + $0x50] sm:$0xff] (!%p1245_p3)  ;;  %v483_v43 = vld [vmem:[#allocation10 + $0x58] sm:$0xff] (!%p1245_p3) }
  0xfb   : > { %v1537_v41 = vpack.c.bf16 %v574_v40, %v573_v38  ;;  %v575_v44 = vld [vmem:[#allocation12 + $0x50] sm:$0xff]  ;;  %v1509_v45 = vpack.c.bf16 %v483_v43, %v482_v42  ;;  %v576_v46 = vld [vmem:[#allocation12 + $0x58] sm:$0xff]  ;;  %v484_v47 = vld [vmem:[#allocation10 + $0x60] sm:$0xff] }
  0xfc   : > { %v485_v48 = vld [vmem:[#allocation10 + $0x68] sm:$0xff]  ;;  %v1541_v49 = vpack.c.bf16 %v576_v46, %v575_v44  ;;  %v577_v50 = vld [vmem:[#allocation12 + $0x60] sm:$0xff]  ;;  %v486_v54 = vld [vmem:[#allocation10 + $0x70] sm:$0xff] }
  0xfd   : > { %1496 = vmatpush3.bf16.msra.mxu0 %v1493_v12  ;;  %1528 = vmatpush3.bf16.msra.mxu1 %v1525_v15  ;;  %v578_v51 = vld [vmem:[#allocation12 + $0x68] sm:$0xff]  ;;  %v1513_v52 = vpack.c.bf16 %v485_v48, %v484_v47  ;;  %v487_v55 = vld [vmem:[#allocation10 + $0x78] sm:$0xff]  ;;  %v579_v57 = vld [vmem:[#allocation12 + $0x70] sm:$0xff] }
  0xfe   : > { %1498 = vmatprep.subr.bf16.mxu0 %v1497_v27  ;;  %1530 = vmatprep.subr.bf16.mxu1 %v1529_v29  ;;  %v1545_v53 = vpack.c.bf16 %v578_v51, %v577_v50  ;;  %v1517_v56 = vpack.c.bf16 %v487_v55, %v486_v54  ;;  %v580_v58 = vld [vmem:[#allocation12 + $0x78] sm:$0xff] }
  0xff   : > { %v1549_v59 = vpack.c.bf16 %v580_v58, %v579_v57 }
 0x101   : > { %1500 = vmatpush3.bf16.msra.mxu0 %v1497_v27  ;;  %1532 = vmatpush3.bf16.msra.mxu1 %v1529_v29 }
 0x102   : > { %1502 = vmatprep.subr.bf16.mxu0 %v1501_v33  ;;  %1534 = vmatprep.subr.bf16.mxu1 %v1533_v35 }
 0x105   : > { %1504 = vmatpush3.bf16.msra.mxu0 %v1501_v33  ;;  %1536 = vmatpush3.bf16.msra.mxu1 %v1533_v35 }
 0x106   : > { %1506 = vmatprep.subr.bf16.mxu0 %v1505_v39  ;;  %1538 = vmatprep.subr.bf16.mxu1 %v1537_v41 }
 0x109   : > { %1508 = vmatpush3.bf16.msra.mxu0 %v1505_v39  ;;  %1540 = vmatpush3.bf16.msra.mxu1 %v1537_v41 }
 0x10a   : > { %1510 = vmatprep.subr.bf16.mxu0 %v1509_v45  ;;  %1542 = vmatprep.subr.bf16.mxu1 %v1541_v49 }
 0x10d   : > { %1512 = vmatpush3.bf16.msra.mxu0 %v1509_v45  ;;  %1544 = vmatpush3.bf16.msra.mxu1 %v1541_v49 }
 0x10e   : > { %1514 = vmatprep.subr.bf16.mxu0 %v1513_v52  ;;  %1546 = vmatprep.subr.bf16.mxu1 %v1545_v53 }
 0x111   : > { %1516 = vmatpush3.bf16.msra.mxu0 %v1513_v52  ;;  %1548 = vmatpush3.bf16.msra.mxu1 %v1545_v53 }
 0x112   : > { %1518 = vmatprep.subr.bf16.mxu0 %v1517_v56  ;;  %1550 = vmatprep.subr.bf16.mxu1 %v1549_v59 }
 0x115   : > { %1520 = vmatpush3.bf16.msra.mxu0 %v1517_v56  ;;  %1552 = vmatpush3.bf16.msra.mxu1 %v1549_v59 }
 0x181   : > { %v434_v16 = vpop.xlane.xlu0 %433 }
 0x182   : > { %v438_v17 = vmul.f32 0.0078125, %v434_v16 }
 0x184   : > { %v2521_v18 = vsub.f32 %v431_v2, %v438_v17 }
 0x185   : > { %v436_v19 = vpop.xlane.xlu0 %435 }
 0x186   : > { %v439_v20 = vmul.f32 0.0078125, %v436_v19  ;;  %v442_v21 = vmul.f32 %v2521_v18, %v2521_v18 }
 0x188   : > { %v2525_v22 = vsub.f32 %v432_v3, %v439_v20  ;;  %444 = vadd.xlane.f32.xlu1 %v442_v21 }
 0x18a   : > { %v443_v23 = vmul.f32 %v2525_v22, %v2525_v22 }
 0x18c   : > { %446 = vadd.xlane.f32.xlu1 %v443_v23 }
 0x215   : > { %v445_v60 = vpop.xlane.xlu1 %444 }
 0x216   : > { %v448_v61 = vmul.f32 0.0078125, %v445_v60 }
 0x218   : > { %v450_v63 = vadd.f32 1e-05, %v448_v61 }
 0x219   : > { %v447_v2 = vpop.xlane.xlu1 %446 }
 0x21a   : > { %1778 = vrsqrt.f32 %v450_v63  ;;  %v449_v3 = vmul.f32 0.0078125, %v447_v2 }
 0x21c   : > { %v451_v5 = vadd.f32 1e-05, %v449_v3 }
 0x21e   : > { %1780 = vrsqrt.f32 %v451_v5 }
 0x224   : > { %v1779_v8 = vpop.eup %1778 }
 0x225   : > { %v454_v9 = vmul.f32 %v1779_v8, %v2521_v18 }
 0x227   : > { %v462_v11 = vmul.f32 %v460_v7, %v454_v9 }
 0x228   : > { %v1781_v12 = vpop.eup %1780 }
 0x229   : > { %v470_v13 = vadd.f32 %v468_v10, %v462_v11  ;;  %v455_v14 = vmul.f32 %v1781_v12, %v2525_v22 }
 0x22b   : > { %1367 = vmatprep.mubr.f32.mxu0 %v470_v13  ;;  %1402 = vmatprep.mubr.f32.mxu1 %v470_v13  ;;  %v463_v15 = vmul.f32 %v460_v7, %v455_v14 }
 0x22d   : > { %v471_v16 = vadd.f32 %v468_v10, %v463_v15 }
 0x22f   : > { %1368 = vmatmul.mubr.f32.vlgmr.msra.gmra.mrb[0].mxu0 %v471_v16  ;;  %1403 = vmatmul.mubr.f32.vlgmr.msra.gmra.mrb[0].mxu1 %v471_v16 }
 0x302   : > { %v1369_v17 = vpop.f32.mrb[0].mxu0  ;;  %v1404_v19 = vpop.f32.mrb[0].mxu1 }
 0x303   : > { %564 = vst [vmem:[#allocation2 + $0x8] sm:$0xff] %v1369_v17  ;;  %657 = vst [vmem:[#allocation3 + $0x8] sm:$0xff] %v1404_v19  ;;  %v554_v20 = vpop.f32.mrb[1].mxu0  ;;  %v647_v21 = vpop.f32.mrb[1].mxu1 }
 0x304   : > { %563 = vst [vmem:[#allocation2] sm:$0xff] %v554_v20  ;;  %656 = vst [vmem:[#allocation3] sm:$0xff] %v647_v21 }
 0x305 PF: > { %v658_v18 = vld [vmem:[%s2486_s8] sm:$0xff]  ;;  %v659_v22 = vld [vmem:[%s2486_s8 + $0x8] sm:$0xff]  ;;  %v684_v60 = vlaneseq  ;;  %vm871_vm0 = vcmask 130048   ;;  %s2676_s17 = sld [smem:[#allocation23_spill]]  ;;  %s2677_s26 = sld [smem:[#allocation24_spill]] }
 0x306   : > { %660 = vadd.xlane.f32.xlu0 %v658_v18  ;;  %v699_v23 = vld [vmem:[#allocation9] sm:$0xff]  ;;  %v700_v24 = vld [vmem:[#allocation9 + $0x8] sm:$0xff]  ;;  %v701_v25 = vld [vmem:[#allocation9 + $0x10] sm:$0xff]  ;;  %s1084_s18 = sshll.u32 %s2518_s4, 4  ;;  %s2678_s19 = sld [smem:[#allocation32_spill]]  ;;  %s2551_s18 = int_to_ptr.vmem [resolvable:$true] %s1084_s18 }
 0x307   : > { %v1553_v26 = vpack.c.bf16 %v700_v24, %v699_v23  ;;  %v702_v27 = vld [vmem:[#allocation9 + $0x18] sm:$0xff]  ;;  %v703_v37 = vld [vmem:[#allocation9 + $0x20] sm:$0xff]  ;;  %v704_v38 = vld [vmem:[#allocation9 + $0x28] sm:$0xff]  ;;  %v685_v2 = vshrl.u32 %v684_v60, 7  ;;  %s1069_s12 = scalar_lea.sflag [#allocation6], %s2482_s22  ;;  %s1966_s24 = scalar_lea.vmem %s2551_s18, 256 }
 0x308   : > { %v1557_v28 = vpack.c.bf16 %v702_v27, %v701_v25  ;;  %v1561_v39 = vpack.c.bf16 %v704_v38, %v703_v37  ;;  %v705_v40 = vld [vmem:[#allocation9 + $0x30] sm:$0xff]  ;;  %v706_v41 = vld [vmem:[#allocation9 + $0x38] sm:$0xff]  ;;  %v707_v43 = vld [vmem:[#allocation9 + $0x40] sm:$0xff]  ;;  %p1967_p1 = scmp.ne.s32.totalorder %s2551_s18, %s1966_s24  ;;  %p2679_p7 = scmp.ne.s32.totalorder %s2665_s20, 0 }
 0x309   : > { %1554 = vmatprep.subr.bf16.mxu0 %v1553_v26  ;;  %v1565_v42 = vpack.c.bf16 %v706_v41, %v705_v40  ;;  %v708_v44 = vld [vmem:[#allocation9 + $0x48] sm:$0xff]  ;;  %v709_v46 = vld [vmem:[#allocation9 + $0x50] sm:$0xff]  ;;  %v710_v47 = vld [vmem:[#allocation9 + $0x58] sm:$0xff]  ;;  %v686_v4 = vsub.s32 0, %v685_v2  ;;  %s2114_s21 = smov [#allocation15]  }
 0x30a   : > { %662 = vadd.xlane.f32.xlu0 %v659_v22  ;;  %1556 = vmatpush3.bf16.msra.mxu0 %v1553_v26  ;;  %v1569_v45 = vpack.c.bf16 %v708_v44, %v707_v43  ;;  %v711_v48 = vld [vmem:[#allocation9 + $0x60] sm:$0xff]  ;;  %v1573_v49 = vpack.c.bf16 %v710_v47, %v709_v46  ;;  %v712_v50 = vld [vmem:[#allocation9 + $0x68] sm:$0xff]  ;;  %v713_v52 = vld [vmem:[#allocation9 + $0x70] sm:$0xff]  ;;  %p1968_p11 = pnand %p1967_p1, %p2679_p7  ;;  %s1970_s11 = sshll.u32 %s2114_s21, 4  ;;  %s1971_s11 = int_to_ptr.vmem [resolvable:$false] %s1970_s11 }
 0x30b   : > { %1558 = vmatprep.subr.bf16.mxu0 %v1557_v28  ;;  %v1577_v51 = vpack.c.bf16 %v712_v50, %v711_v48  ;;  %v714_v53 = vld [vmem:[#allocation9 + $0x78] sm:$0xff]  ;;  %v792_v55 = vld [vmem:[#allocation2] sm:$0xff]  ;;  %v687_v5 = vrot.slane %v2511_v0, %v686_v4  ;;  %v695_v8 = vrot.slane %v2516_v1, %v686_v4  ;;  %v979_v46 = vld [vmem:[#allocation13 + $0x20] sm:$0xff]  ;;  %s1249_s6 = sshll.u32 %s2676_s17, 1  ;;  %s1250_s5 = sshll.u32 %s2677_s26, 2 }
 0x30c   : > { %v1581_v54 = vpack.c.bf16 %v714_v53, %v713_v52  ;;  %v793_v56 = vld [vmem:[#allocation2 + $0x8] sm:$0xff]  ;;  %v977_v40 = vld [vmem:[#allocation13 + $0x10] sm:$0xff]  ;;  %v980_v47 = vld [vmem:[#allocation13 + $0x28] sm:$0xff]  ;;  %s1081_s28 = sadd.s32 %s1250_s5, %s1249_s6  ;;  %p1969_p0 = pneg %p1968_p11 }
 0x30d   : > { %v1585_v57 = vpack.c.bf16 %v793_v56, %v792_v55  ;;  %v978_v41 = vld [vmem:[#allocation13 + $0x18] sm:$0xff]  ;;  %v1601_v48 = vpack.c.bf16 %v980_v47, %v979_v46  ;;  %v983_v52 = vld [vmem:[#allocation13 + $0x40] sm:$0xff]  ;;  %v984_v53 = vld [vmem:[#allocation13 + $0x48] sm:$0xff]  ;;  %s1251_s1 = sshll.u32 %s1081_s28, 7  ;;  %s1972_s17 = scalar_lea.vmem %s1971_s11, 512 }
 0x30e   : > { %1560 = vmatpush3.bf16.msra.mxu0 %v1557_v28  ;;  %v982_v50 = vld [vmem:[#allocation13 + $0x38] sm:$0xff]  ;;  %v985_v55 = vld [vmem:[#allocation13 + $0x50] sm:$0xff]  ;;  %s2549_s23 = scalar_lea.hbm %s2678_s19, %s1251_s1  ;;  %p1973_p5 = scmp.lt.s32.totalorder %s2551_s18, %s1971_s11 }
 0x30f   : > { %1562 = vmatprep.subr.bf16.mxu0 %v1561_v39  ;;  %v986_v56 = vld [vmem:[#allocation13 + $0x58] sm:$0xff]  ;;  %p1974_p8 = scmp.lt.s32.totalorder %s1972_s17, %s1966_s24 }
 0x311   : > { %p1975_p4 = por %p1974_p8, %p1973_p5 }
 0x312   : > { %1564 = vmatpush3.bf16.msra.mxu0 %v1561_v39 }
 0x313   : > { %1566 = vmatprep.subr.bf16.mxu0 %v1565_v42  ;;  %p1976_p12 = pnand %p1975_p4, %p1969_p0 }
 0x316   : > { %1568 = vmatpush3.bf16.msra.mxu0 %v1565_v42 }
 0x317   : > { %1570 = vmatprep.subr.bf16.mxu0 %v1569_v45 }
 0x31a   : > { %1572 = vmatpush3.bf16.msra.mxu0 %v1569_v45  ;;  %v1597_v45 = vpack.c.bf16 %v978_v41, %v977_v40 }
 0x31b   : > { %1574 = vmatprep.subr.bf16.mxu0 %v1573_v49 }
 0x31e   : > { %1576 = vmatpush3.bf16.msra.mxu0 %v1573_v49  ;;  %v981_v49 = vld [vmem:[#allocation13 + $0x30] sm:$0xff] }
 0x31f   : > { %1578 = vmatprep.subr.bf16.mxu0 %v1577_v51 }
 0x322   : > { %1580 = vmatpush3.bf16.msra.mxu0 %v1577_v51  ;;  %v1605_v51 = vpack.c.bf16 %v982_v50, %v981_v49 }
 0x323   : > { %1582 = vmatprep.subr.bf16.mxu0 %v1581_v54 }
 0x326   : > { %1584 = vmatpush3.bf16.msra.mxu0 %v1581_v54  ;;  %v1609_v54 = vpack.c.bf16 %v984_v53, %v983_v52 }
 0x327   : > { %1586 = vmatprep.subr.bf16.mxu0 %v1585_v57 }
 0x393   : > { %v661_v29 = vpop.xlane.xlu0 %660 }
 0x394   : > { %v665_v30 = vmul.f32 0.0078125, %v661_v29 }
 0x396   : > { %v667_v31 = vsub.f32 %v658_v18, %v665_v30 }
 0x397   : > { %v663_v32 = vpop.xlane.xlu0 %662 }
 0x398   : > { %v666_v33 = vmul.f32 0.0078125, %v663_v32  ;;  %v669_v34 = vmul.f32 %v667_v31, %v667_v31  ;;  %v795_v32 = vld [vmem:[#allocation3 + $0x8] sm:$0xff] }
 0x39a   : > { %v668_v35 = vsub.f32 %v659_v22, %v666_v33  ;;  %671 = vadd.xlane.f32.xlu1 %v669_v34  ;;  %v975_v34 = vld [vmem:[#allocation13] sm:$0xff] }
 0x39c   : > { %v670_v36 = vmul.f32 %v668_v35, %v668_v35 }
 0x39e   : > { %673 = vadd.xlane.f32.xlu1 %v670_v36 }
 0x427   : > { %v672_v58 = vpop.xlane.xlu1 %671 }
 0x428   : > { %v675_v59 = vmul.f32 0.0078125, %v672_v58  ;;  %v987_v58 = vld [vmem:[#allocation13 + $0x60] sm:$0xff] }
 0x42a   : > { %v677_v61 = vadd.f32 1e-05, %v675_v59  ;;  %v988_v59 = vld [vmem:[#allocation13 + $0x68] sm:$0xff] }
 0x42b   : > { %v674_v62 = vpop.xlane.xlu1 %673  ;;  %v1617_v60 = vpack.c.bf16 %v988_v59, %v987_v58 }
 0x42c   : > { %1782 = vrsqrt.f32 %v677_v61  ;;  %v676_v63 = vmul.f32 0.0078125, %v674_v62  ;;  %v989_v61 = vld [vmem:[#allocation13 + $0x70] sm:$0xff]  ;;  %v990_v62 = vld [vmem:[#allocation13 + $0x78] sm:$0xff] }
 0x42e   : > { %v678_v3 = vadd.f32 1e-05, %v676_v63  ;;  %v1621_v63 = vpack.c.bf16 %v990_v62, %v989_v61 }
 0x430   : > { %1784 = vrsqrt.f32 %v678_v3 }
 0x436   : > { %v1783_v6 = vpop.eup %1782 }
 0x437   : > { %v681_v7 = vmul.f32 %v1783_v6, %v667_v31  ;;  %v794_v31 = vld [vmem:[#allocation3] sm:$0xff] }
 0x438   : > { %v1589_v33 = vpack.c.bf16 %v795_v32, %v794_v31 }
 0x439   : > { %v689_v9 = vmul.f32 %v687_v5, %v681_v7 }
 0x43a   : > { %v1785_v10 = vpop.eup %1784  ;;  %1590 = vmatprep.subr.bf16.mxu1 %v1589_v33 }
 0x43b   : > { %v697_v11 = vadd.f32 %v695_v8, %v689_v9  ;;  %v682_v12 = vmul.f32 %v1785_v10, %v668_v35  ;;  %1592 = vmatpush3.bf16.msra.mxu1 %v1589_v33  ;;  %v976_v35 = vld [vmem:[#allocation13 + $0x8] sm:$0xff] }
 0x43c   : > { %v1593_v36 = vpack.c.bf16 %v976_v35, %v975_v34 }
 0x43d   : > { %1437 = vmatprep.mubr.f32.mxu0 %v697_v11  ;;  %v690_v13 = vmul.f32 %v687_v5, %v682_v12 }
 0x43e   : > { %1594 = vmatprep.subr.bf16.mxu1 %v1593_v36 }
 0x43f   : > { %v698_v14 = vadd.f32 %v695_v8, %v690_v13 }
 0x441   : > { %1438 = vmatmul.mubr.f32.vlgmr.msra.gmra.mrb[0].mxu0 %v698_v14 }
 0x442   : > { %1588 = vmatpush3.bf16.xpose.msra.mxu0 %v1585_v57  ;;  %v1613_v57 = vpack.c.bf16 %v986_v56, %v985_v55 }
 0x514   : > { %v1439_v15 = vpop.f32.mrb[0].mxu0 }
 0x515   : > { %v781_v16 = vpop.f32.mrb[1].mxu0  ;;  %v791_v19 = vmul.f32 0.088388346, %v1439_v15 }
 0x516   : > { %v790_v17 = vmul.f32 0.088388346, %v781_v16 }
 0x518   : > { %1444 = vmatprep.mubr.f32.mxu0 %v790_v17 }
 0x519   : > { %1445 = vmatmul.mubr.f32.vlgmr.msra.gmra.mrb[2].mxu0 %v791_v19 }
 0x5ec   : > { %v1446_v0 = vpop.f32.mrb[2].mxu0 }
 0x5ed   : > { %v862_v20 = vpop.f32.mrb[3].mxu0  ;;  %v875_v1 = vsel %vm871_vm0, %v1446_v0, -inf }
 0x5ee   : > { %876 = vmax.xlane.f32.xlu1 %v875_v1  ;;  %v872_v21 = vsel %vm871_vm0, %v862_v20, -inf }
 0x5ef   : > { %873 = vmax.xlane.f32.xlu0 %v872_v21 }
 0x67b   : > { %v877_v18 = vpop.xlane.xlu1 %876 }
 0x67c   : > { %v879_v22 = vsub.f32 %v1446_v0, %v877_v18  ;;  %v874_v23 = vpop.xlane.xlu0 %873 }
 0x67d   : > { %v878_v24 = vsub.f32 %v862_v20, %v874_v23 }
 0x67e   : > { %v882_v25 = vmul.f32 1.442695, %v879_v22 }
 0x67f   : > { %v880_v26 = vmul.f32 1.442695, %v878_v24 }
 0x680   : > { %1786 = vpow2.f32 %v882_v25 }
 0x681   : > { %1788 = vpow2.f32 %v880_v26 }
 0x68a   : > { %v1787_v27 = vpop.eup %1786 }
 0x68b   : > { %v1789_v28 = vpop.eup %1788  ;;  %v887_v29 = vsel %vm871_vm0, %v1787_v27, 0.0 }
 0x68c   : > { %888 = vadd.xlane.f32.xlu1 %v887_v29  ;;  %v884_v30 = vsel %vm871_vm0, %v1789_v28, 0.0 }
 0x68d   : > { %885 = vadd.xlane.f32.xlu0 %v884_v30 }
 0x719   : > { %v889_v37 = vpop.xlane.xlu1 %888 }
 0x71a   : > { %1790 = vrcp.f32 %v889_v37  ;;  %v886_v38 = vpop.xlane.xlu0 %885 }
 0x71b   : > { %1792 = vrcp.f32 %v886_v38 }
 0x724   : > { %v1791_v39 = vpop.eup %1790 }
 0x725   : > { %v1793_v42 = vpop.eup %1792  ;;  %v893_v44 = vmul.f32 %v1791_v39, %v1787_v27 }
 0x726   : > { %v892_v43 = vmul.f32 %v1793_v42, %v1789_v28 }
 0x728   : > { %1451 = vmatprep.mubr.msk.f32.mxu1 %vm871_vm0, %v892_v43 }
 0x729   : > { %1452 = vmatmul.mubr.msk.f32.vlgmr.msra.gmra.mrb[0].mxu1 %vm871_vm0, %v893_v44 }
 0x72a   : > { %1596 = vmatpush3.bf16.msra.mxu1 %v1593_v36 }
 0x72b   : > { %1598 = vmatprep.subr.bf16.mxu1 %v1597_v45 }
 0x72e   : > { %1600 = vmatpush3.bf16.msra.mxu1 %v1597_v45 }
 0x72f   : > { %1602 = vmatprep.subr.bf16.mxu1 %v1601_v48 }
 0x732   : > { %1604 = vmatpush3.bf16.msra.mxu1 %v1601_v48 }
 0x733   : > { %1606 = vmatprep.subr.bf16.mxu1 %v1605_v51 }
 0x736   : > { %1608 = vmatpush3.bf16.msra.mxu1 %v1605_v51 }
 0x737   : > { %1610 = vmatprep.subr.bf16.mxu1 %v1609_v54 }
 0x73a   : > { %1612 = vmatpush3.bf16.msra.mxu1 %v1609_v54 }
 0x73b   : > { %1614 = vmatprep.subr.bf16.mxu1 %v1613_v57 }
 0x73e   : > { %1616 = vmatpush3.bf16.msra.mxu1 %v1613_v57 }
 0x73f   : > { %1618 = vmatprep.subr.bf16.mxu1 %v1617_v60 }
 0x742   : > { %1620 = vmatpush3.bf16.msra.mxu1 %v1617_v60 }
 0x743   : > { %1622 = vmatprep.subr.bf16.mxu1 %v1621_v63 }
 0x746   : > { %1624 = vmatpush3.bf16.msra.mxu1 %v1621_v63 }
 0x7fc   : > { %v1453_v2 = vpop.f32.mrb[0].mxu1 }
 0x7fd   : > { %v966_v3 = vpop.f32.mrb[1].mxu1 }
 0x7fe   : > { %1486 = vmatprep.mubr.f32.mxu1 %v966_v3 }
 0x7ff   : > { %1487 = vmatmul.mubr.f32.vlgmr.msra.gmra.mrb[2].mxu1 %v1453_v2 }
 0x8d2   : > { %v1488_v4 = vpop.f32.mrb[2].mxu1 }
 0x8d3   : > { %1067 = vst [vmem:[%s2518_s4 + $0x8] sm:$0xff] %v1488_v4  ;;  %v1057_v5 = vpop.f32.mrb[3].mxu1 }
 0x8d4   : > { %1066 = vst [vmem:[%s2518_s4] sm:$0xff] %v1057_v5 }
 0x8d5   : > { %1979 = shalt.err (!%p1976_p12)
}
 0x8d6   : > { %s1980_s4 = scalar_lea.hbm %s2549_s23, 256  ;;  %s1984_s5 = scalar_lea.hbm %s2678_s19, 1024 }
 0x8d7   : > { %p1981_p2 = scmp.ne.s32.totalorder %s2549_s23, %s1980_s4  ;;  %p1985_p6 = scmp.lt.u32.totalorder %s2549_s23, %s2678_s19 }
 0x8d8   : > { %p1986_p13 = scmp.lt.u32.totalorder %s1984_s5, %s1980_s4  ;;  %p1988_p1 = scmp.lt.u32.totalorder %s1980_s4, %s2549_s23 }
 0x8d9   : > { %p1982_p9 = pnand %p1981_p2, %p2679_p7 }
 0x8da   : > { %p1987_p3 = por %p1986_p13, %p1985_p6 }
 0x8db   : > { %p1983_p10 = pneg %p1982_p9 }
 0x8dc   : > { %p1989_p11 = por %p1988_p1, %p1987_p3 }
 0x8de   : > { %p1990_p0 = pnand %p1989_p11, %p1983_p10 }
 0x8e0   : > { %1993 = shalt.err (!%p1990_p0)
}
 0x8e1   : > { %s2115_s8 = smov 128   ;;  %s2116_s7 = smov 8  }
 0x8e2   : > { %1645 = dma.vmem_to_hbm [thread:$0]  (%p2679_p7), %s2551_s18, 256, %s2549_s23, %s1069_s12, %s2115_s8, %s2115_s8, %s2116_s7  }
 0x8e3 PF: > { %p1680_p5 = scmp.ge.s32.totalorder %s2104_s15, 2  ;;  %s1099_s24 = sand.u32 1, %s2076_s30  }
 0x8e4   : > { %p2680_p8 = scmp.ne.s32.totalorder %s2666_s16, 0  ;;  %s1100_s21 = scalar_lea.sflag [#allocation6], %s1099_s24 }
 0x8e6   : > { %p1668_p4 = pnand %p1680_p5, %p2680_p8 }
 0x8e8   : > { %2059 = dma.done.wait (!%p1668_p4), %s1100_s21, 256  }
 0x8e9   : > { %2061 = vsyncadd (!%p1668_p4), %s1100_s21, 4294967040  ;;  %s27_s15 = sadd.s32 1, %s2104_s15   ;;  %s2681_s11 = sld [smem:[#allocation22_spill]] }
 0x8ea   : > { %p24_p12 = scmp.ge.s32.totalorder %s27_s15, 6   ;;  %s2682_s20 = smov %s2694_s27 }
 0x8eb   : > { %s2684_s28 = smov %s2072_s29  ;;  %s2685_s29 = smov %s2426_s2 }
 0x8ec   : > { %s2686_s30 = smov %s2080_s9  ;;  %s2687_s9 = smov %s2084_s10 }
 0x8ed   : > { %s2688_s10 = smov %s2429_s25  ;;  %s2690_s12 = smov %s2100_s14 }
 0x8ee   : > { %s2692_s14 = smov %s2698_s3  ;;  %26 = sbr.rel (!%p24_p12) target bundleno = 21 (0x15), region = 122 }
 0x8ef   : > { %s2683_s27 = smov %s2681_s11  ;;  %s2689_s11 = smov %s2096_s13 }
 0x8f0   : > { %s2691_s13 = smov %s2682_s20 }
 0x8f5   :  { %1105 = vsyncpa [#allocation5], 1 }
 0x8f6   :  { %1107 = vsyncpa [#allocation5 + $0x1], 1 }
 0x8f7   :  { %1108 = vsyncpa [#allocation8], 1 }
 0x8f8   :  { %1109 = vsyncpa [#allocation11], 1 }
 0x8f9   :  { %1110 = vsyncpa [#allocation14], 1 }
 0x8fa   :  { %1111 = vsyncpa [#allocation6], 1 }
 0x8fb   :  { %1113 = vsyncpa [#allocation6 + $0x1], 1 }

// kernel: tpu_custom_call.1
= control target key start
LH: loop header
LB: loop body
LE: loop exit
PB: predicated region body
PF: predicated region fallthrough
CT: control target
= control target key end

     0   :  { %s2660_s0 = inlined_call_operand.hbm [shape: f32[2,32,128], index: 0, kind: input, shape index: {}]   ;;  %s2661_s1 = inlined_call_operand.hbm [shape: f32[2,16,128], index: 1, kind: input, shape index: {}]   ;;  %s2662_s2 = inlined_call_operand.vmem [shape: f32[1,128], index: 2, kind: input, shape index: {}]   ;;  %s2663_s3 = inlined_call_operand.vmem [shape: f32[1,128], index: 3, kind: input, shape index: {}]   ;;  %s2664_s4 = inlined_call_operand.hbm [shape: f32[128,128], index: 4, kind: input, shape index: {}]   ;;  %s2665_s5 = inlined_call_operand.hbm [shape: f32[128,128], index: 5, kind: input, shape index: {}]   ;;  %s2666_s6 = inlined_call_operand.hbm [shape: f32[128,128], index: 6, kind: input, shape index: {}]   ;;  %s2667_s7 = inlined_call_operand.hbm [shape: f32[128,128], index: 7, kind: input, shape index: {}]   ;;  %s2668_s8 = inlined_call_operand.hbm [shape: f32[2,32,128], index: 8, kind: output, shape index: {}]  }
   0x1   :  { %2683 = sst [smem:[#allocation26_spill]] %s2660_s0 }
   0x2   :  { %2684 = sst [smem:[#allocation27_spill]] %s2662_s2 }
   0x3   :  { %2685 = sst [smem:[#allocation28_spill]] %s2663_s3 }
   0x4   :  { %2686 = sst [smem:[#allocation29_spill]] %s2664_s4 }
   0x5   :  { %2687 = sst [smem:[#allocation30_spill]] %s2665_s5 }
   0x6   :  { %2688 = sst [smem:[#allocation31_spill]] %s2666_s6 }
   0x7   :  { %2689 = sst [smem:[#allocation32_spill]] %s2667_s7 }
   0x8   :  { %2690 = sst [smem:[#allocation33_spill]] %s2668_s8 }
   0x9   :  { %13 = vsyncpa [#allocation5], 0 }
   0xa   :  { %15 = vsyncpa [#allocation5 + $0x1], 0 }
   0xb   :  { %16 = vsyncpa [#allocation8], 0 }
   0xc   :  { %18 = vsyncpa [#allocation8 + $0x1], 0 }
   0xd   :  { %19 = vsyncpa [#allocation11], 0 }
   0xe   :  { %20 = vsyncpa [#allocation14], 0 }
   0xf   :  { %21 = vsyncpa [#allocation6], 0 }
  0x10   :  { %23 = vsyncpa [#allocation6 + $0x1], 0  ;;  %s2191_s27 = smov 0   ;;  %s2193_s28 = smov 0  }
  0x11   :  { %s2195_s29 = smov 0   ;;  %s2197_s30 = smov 0  }
  0x12   :  { %s2199_s9 = smov 0   ;;  %s2201_s10 = smov 0  }
  0x13   :  { %s2203_s11 = smov 0   ;;  %s2205_s12 = smov 0  }
  0x14   :  { %s2207_s13 = smov 0   ;;  %s2209_s14 = smov 0  }
  0x15   :  { %s2211_s15 = smov 0  }
  0x16 LB: > { %2691 = sst [smem:[#allocation22_spill]] %s2117_s11  ;;  %s2245_s16 = sadd.s32 4294967295, %s2133_s15   ;;  %s2133_s15 = sphi %s2211_s15, %s29_s15   ;;  %s2129_s14 = sphi %s2209_s14, %s2744_s14   ;;  %s2125_s13 = sphi %s2207_s13, %s2743_s13   ;;  %s2121_s12 = sphi %s2205_s12, %s2742_s12   ;;  %s2117_s11 = sphi %s2203_s11, %s2741_s11   ;;  %s2113_s10 = sphi %s2201_s10, %s2740_s10   ;;  %s2109_s9 = sphi %s2199_s9, %s2739_s9   ;;  %s2105_s30 = sphi %s2197_s30, %s2738_s30   ;;  %s2101_s29 = sphi %s2195_s29, %s2737_s29   ;;  %s2097_s28 = sphi %s2193_s28, %s2736_s28   ;;  %s2093_s27 = sphi %s2191_s27, %s2735_s27  }
  0x17   : > { %2692 = sst [smem:[#allocation23_spill]] %s2121_s12  ;;  %p89_p0 = scmp.ne.s32.totalorder %s2097_s28, %s2093_s27 }
  0x18   : > { %p2670_p1 = scmp.eq.s32.totalorder %s2245_s16, 0  ;;  %p1254_p3 = scmp.ge.s32.totalorder %s2133_s15, 1 }
  0x19   : > { %p254_p4 = scmp.lt.s32.totalorder %s2133_s15, 5  ;;  %s2135_s19 = smov [#allocation9]  }
  0x1a   : > { %p2254_p5 = por %p89_p0, %p2670_p1  ;;  %s272_s20 = sshll.u32 %s2135_s19, 4  ;;  %s273_s20 = int_to_ptr.vmem [resolvable:$true] %s272_s20 }
  0x1b   : > { %p2258_p6 = pnand %p1254_p3, %p254_p4  ;;  %s2136_s22 = smov [#allocation10]  }
  0x1c   : > { %s2693_s17 = scalar_select %p2254_p5, 1, 0 }
  0x1d   : > { %s2695_s18 = scalar_select %p2258_p6, 1, 0 }
  0x1e   : > { %2694 = sst [smem:[#allocation24_spill]] %s2693_s17  ;;  %p1677_p7 = pneg %p2258_p6 }
  0x1f   : > { %2696 = sst [smem:[#allocation25_spill]] %s2695_s18  ;;  %s285_s23 = sshll.u32 %s2136_s22, 4  ;;  %s2270_s23 = int_to_ptr.vmem [resolvable:$true] %s285_s23 }
  0x20   : > { %p2266_p8 = pnand %p1677_p7, %p2670_p1  ;;  %s2698_s4 = sld [smem:[#allocation29_spill]] }
  0x22   : > { %p2280_p10 = pneg %p2266_p8 }
  0x26   : > { %s1823_s26 = scalar_lea.hbm %s2698_s4, 2048 }
  0x27   : > { %p1824_p9 = scmp.ne.s32.totalorder %s2698_s4, %s1823_s26  ;;  %p1830_p13 = scmp.lt.u32.totalorder %s1823_s26, %s2698_s4 }
  0x29   : > { %p1826_p11 = pnand %p2280_p10, %p1824_p9 }
  0x2b   : > { %p1827_p12 = pneg %p1826_p11 }
  0x2d   : > { %p1832_p0 = pnand %p1830_p13, %p1827_p12 }
  0x2f   : > { %1835 = shalt.err (!%p1832_p0)
}
  0x30   : > { %s1836_s24 = scalar_lea.vmem %s273_s20, 2048  ;;  %p1844_p1 = scmp.lt.s32.totalorder %s273_s20, %s273_s20 }
  0x31   : > { %p1837_p3 = scmp.ne.s32.totalorder %s273_s20, %s1836_s24  ;;  %p1845_p2 = scmp.lt.s32.totalorder %s1836_s24, %s1836_s24 }
  0x33   : > { %p1839_p4 = pnand %p1837_p3, %p2280_p10  ;;  %p1846_p5 = por %p1845_p2, %p1844_p1 }
  0x35   : > { %p1840_p7 = pneg %p1839_p4 }
  0x37   : > { %p1847_p6 = pnand %p1846_p5, %p1840_p7 }
  0x39   : > { %1850 = shalt.err (!%p1847_p6)
}
  0x3a   : > { %s2676_s8 = smov 128   ;;  %s2678_s25 = smov 8  }
  0x3b   : > { %1680 = dma.hbm_to_vmem [thread:$0]  (!%p2266_p8), %s2698_s4, 2048, %s273_s20, [#allocation8], %s2676_s8, %s2676_s8, %s2678_s25  }
  0x3c   : > { %s2700_s5 = sld [smem:[#allocation30_spill]] }
  0x42   : > { %s1851_s11 = scalar_lea.hbm %s2700_s5, 2048 }
  0x43   : > { %p1852_p1 = scmp.ne.s32.totalorder %s2700_s5, %s1851_s11  ;;  %p1858_p6 = scmp.lt.u32.totalorder %s1851_s11, %s2700_s5 }
  0x45   : > { %p1854_p2 = pnand %p1852_p1, %p2280_p10 }
  0x47   : > { %p1855_p5 = pneg %p1854_p2 }
  0x49   : > { %p1860_p9 = pnand %p1858_p6, %p1855_p5 }
  0x4b   : > { %1863 = shalt.err (!%p1860_p9)
}
  0x4c   : > { %s1864_s20 = scalar_lea.vmem %s2270_s23, 2048  ;;  %p1872_p0 = scmp.lt.s32.totalorder %s2270_s23, %s2270_s23 }
  0x4d   : > { %p1865_p11 = scmp.ne.s32.totalorder %s2270_s23, %s1864_s20  ;;  %p1873_p3 = scmp.lt.s32.totalorder %s1864_s20, %s1864_s20 }
  0x4f   : > { %p1867_p12 = pnand %p1865_p11, %p2280_p10  ;;  %p1874_p4 = por %p1873_p3, %p1872_p0 }
  0x51   : > { %p1868_p13 = pneg %p1867_p12 }
  0x53   : > { %p1875_p7 = pnand %p1874_p4, %p1868_p13 }
  0x55   : > { %1878 = shalt.err (!%p1875_p7)
}
  0x56   : > { %1683 = dma.hbm_to_vmem [thread:$0]  (!%p2266_p8), %s2700_s5, 2048, %s2270_s23, [#allocation11], %s2676_s8, %s2676_s8, %s2678_s25  }
  0x57   : > { %s2139_s11 = smov [#allocation12]   ;;  %s2140_s12 = smov [#allocation13]  }
  0x58   : > { %s298_s17 = sshll.u32 %s2139_s11, 4  ;;  %s311_s26 = sshll.u32 %s2140_s12, 4  ;;  %s299_s17 = int_to_ptr.vmem [resolvable:$true] %s298_s17  ;;  %s312_s26 = int_to_ptr.vmem [resolvable:$true] %s311_s26 }
  0x59   : > { %s2701_s6 = sld [smem:[#allocation31_spill]] }
  0x5f   : > { %s1879_s24 = scalar_lea.hbm %s2701_s6, 2048 }
  0x60   : > { %p1880_p1 = scmp.ne.s32.totalorder %s2701_s6, %s1879_s24  ;;  %p1886_p6 = scmp.lt.u32.totalorder %s1879_s24, %s2701_s6 }
  0x62   : > { %p1882_p2 = pnand %p1880_p1, %p2280_p10 }
  0x64   : > { %p1883_p5 = pneg %p1882_p2 }
  0x66   : > { %p1888_p9 = pnand %p1886_p6, %p1883_p5 }
  0x68   : > { %1891 = shalt.err (!%p1888_p9)
}
  0x69   : > { %s1892_s23 = scalar_lea.vmem %s299_s17, 2048  ;;  %p1900_p0 = scmp.lt.s32.totalorder %s299_s17, %s299_s17 }
  0x6a   : > { %p1893_p11 = scmp.ne.s32.totalorder %s299_s17, %s1892_s23  ;;  %p1901_p3 = scmp.lt.s32.totalorder %s1892_s23, %s1892_s23 }
  0x6c   : > { %p1895_p12 = pnand %p1893_p11, %p2280_p10  ;;  %p1902_p4 = por %p1901_p3, %p1900_p0 }
  0x6e   : > { %p1896_p13 = pneg %p1895_p12 }
  0x70   : > { %p1903_p7 = pnand %p1902_p4, %p1896_p13 }
  0x72   : > { %1906 = shalt.err (!%p1903_p7)
}
  0x73   : > { %1686 = dma.hbm_to_vmem [thread:$0]  (!%p2266_p8), %s2701_s6, 2048, %s299_s17, [#allocation11], %s2676_s8, %s2676_s8, %s2678_s25  }
  0x74   : > { %s2702_s7 = sld [smem:[#allocation32_spill]] }
  0x7a   : > { %s1907_s12 = scalar_lea.hbm %s2702_s7, 2048 }
  0x7b   : > { %p1908_p1 = scmp.ne.s32.totalorder %s2702_s7, %s1907_s12  ;;  %p1914_p6 = scmp.lt.u32.totalorder %s1907_s12, %s2702_s7 }
  0x7d   : > { %p1910_p2 = pnand %p1908_p1, %p2280_p10 }
  0x7f   : > { %p1911_p5 = pneg %p1910_p2 }
  0x81   : > { %p1916_p9 = pnand %p1914_p6, %p1911_p5 }
  0x83   : > { %1919 = shalt.err (!%p1916_p9)
}
  0x84   : > { %s1920_s2 = scalar_lea.vmem %s312_s26, 2048  ;;  %p1928_p0 = scmp.lt.s32.totalorder %s312_s26, %s312_s26 }
  0x85   : > { %p1921_p11 = scmp.ne.s32.totalorder %s312_s26, %s1920_s2  ;;  %p1929_p3 = scmp.lt.s32.totalorder %s1920_s2, %s1920_s2 }
  0x87   : > { %p1923_p12 = pnand %p1921_p11, %p2280_p10  ;;  %p1930_p4 = por %p1929_p3, %p1928_p0 }
  0x89   : > { %p1924_p13 = pneg %p1923_p12 }
  0x8b   : > { %p1931_p7 = pnand %p1930_p4, %p1924_p13 }
  0x8d   : > { %1934 = shalt.err (!%p1931_p7)
}
  0x8e   : > { %1689 = dma.hbm_to_vmem [thread:$0]  (!%p2266_p8), %s2702_s7, 2048, %s312_s26, [#allocation14], %s2676_s8, %s2676_s8, %s2678_s25  }
  0x8f   : > { %s1253_s21 = sadd.s32 4294967294, %s2133_s15   ;;  %s38_s19 = sadd.s32 1, %s2125_s13 }
  0x90   : > { %s41_s4 = sadd.s32 1, %s2129_s14  ;;  %p39_p10 = scmp.ge.s32.totalorder %s38_s19, 2 }
  0x91   : > { %s50_s18 = sadd.s32 1, %s2113_s10  ;;  %p57_p1 = scmp.ne.s32.totalorder %s2113_s10, %s2109_s9 }
  0x92   : > { %p2681_p2 = scmp.eq.s32.totalorder %s2133_s15, 0  ;;  %s2746_s19 = smov (%p39_p10, %s38_s19), 0 }
  0x93   : > { %s2748_s4 = smov (!%p39_p10, %s41_s4), %s2129_s14  ;;  %s46_s3 = ssub.s32 %s2125_s13, %s2746_s19 }
  0x94   : > { %p2381_p5 = por %p2681_p2, %p57_p1  ;;  %p43_p8 = scmp.ge.s32.totalorder %s2748_s4, 2 }
  0x95   : > { %p63_p6 = scmp.ne.s32.totalorder %s2109_s9, %s2105_s30  ;;  %p2704_p9 = scmp.eq.s32.totalorder %s2245_s16, 3 }
  0x96   : > { %p247_p12 = scmp.eq.s32.totalorder %s1253_s21, 3  ;;  %s2750_s4 = smov (%p43_p8, %s2748_s4), 0 }
  0x97   : > { %p2389_p11 = por %p2704_p9, %p57_p1  ;;  %p2706_p13 = scmp.eq.s32.totalorder %s2245_s16, 0 }
  0x98   : > { %p2401_p3 = por %p247_p12, %p63_p6  ;;  %s2407_s22 = ssub.s32 %s2129_s14, %s2750_s4 }
  0x99   : > { %s2705_s11 = scalar_select %p2389_p11, 1, 0 }
  0x9a   : > { %p2397_p0 = por %p2706_p13, %p63_p6  ;;  %p2680_p4 = scmp.lt.s32.totalorder %s2133_s15, 4 }
  0x9b   : > { %s2708_s27 = scalar_select %p2401_p3, 1, 0 }
  0x9c   : > { %s47_s24 = sor.u32 %s46_s3, %s2407_s22  ;;  %s325_s20 = sand.u32 1, %s2113_s10  }
  0x9d   : > { %p48_p10 = scmp.eq.s32.totalorder %s47_s24, 0  ;;  %s1260_s2 = sshll.u32 %s325_s20, 4 }
  0x9e   : > { %s1261_s23 = sshll.u32 %s2125_s13, 1  ;;  %s1262_s21 = sshll.u32 %s2129_s14, 2 }
  0x9f   : > { %s2414_s17 = scalar_select %p48_p10, %s2113_s10, %s50_s18  }
  0xa0   : > { %s329_s8 = scalar_lea.vmem [#allocation4], %s1260_s2  ;;  %s335_s5 = sadd.s32 %s1262_s21, %s1261_s23 }
  0xa1   : > { %s338_s25 = sshll.u32 %s329_s8, 4  ;;  %s1263_s6 = sshll.u32 %s335_s5, 7  ;;  %s2418_s25 = int_to_ptr.vmem [resolvable:$true] %s338_s25 }
  0xa2   : > { %p2424_p1 = pnand %p2680_p4, %p2381_p5  ;;  %s2710_s0 = sld [smem:[#allocation26_spill]] }
  0xa3   : > { %s2433_s8 = scalar_lea.sflag [#allocation5], %s325_s20 }
  0xa4   : > { %p1937_p5 = pneg %p2424_p1 }
  0xa8   : > { %s2431_s18 = scalar_lea.hbm %s2710_s0, %s1263_s6  ;;  %s1940_s23 = scalar_lea.hbm %s2710_s0, 1024 }
  0xa9   : > { %s1935_s5 = scalar_lea.hbm %s2431_s18, 256  ;;  %p1941_p12 = scmp.lt.u32.totalorder %s2431_s18, %s2710_s0 }
  0xaa   : > { %p1936_p8 = scmp.ne.s32.totalorder %s2431_s18, %s1935_s5  ;;  %p1942_p13 = scmp.lt.u32.totalorder %s1940_s23, %s1935_s5 }
  0xab   : > { %p1944_p4 = scmp.lt.u32.totalorder %s1935_s5, %s2431_s18 }
  0xac   : > { %p1938_p6 = pnand %p1937_p5, %p1936_p8  ;;  %p1943_p10 = por %p1942_p13, %p1941_p12 }
  0xae   : > { %p1939_p9 = pneg %p1938_p6  ;;  %p1945_p2 = por %p1944_p4, %p1943_p10 }
  0xb0   : > { %p1946_p7 = pnand %p1945_p2, %p1939_p9 }
  0xb2   : > { %1949 = shalt.err (!%p1946_p7)
}
  0xb3   : > { %s1950_s20 = scalar_lea.vmem %s2418_s25, 256  ;;  %s2141_s3 = smov [#allocation4]  }
  0xb4   : > { %p1951_p8 = scmp.ne.s32.totalorder %s2418_s25, %s1950_s20  ;;  %s1955_s24 = sshll.u32 %s2141_s3, 4  ;;  %s1956_s24 = int_to_ptr.vmem [resolvable:$false] %s1955_s24 }
  0xb5   : > { %s1957_s26 = scalar_lea.vmem %s1956_s24, 512  ;;  %p1958_p11 = scmp.lt.s32.totalorder %s2418_s25, %s1956_s24 }
  0xb6   : > { %p1953_p6 = pnand %p1951_p8, %p1937_p5  ;;  %p1959_p12 = scmp.lt.s32.totalorder %s1957_s26, %s1950_s20 }
  0xb8   : > { %p1954_p3 = pneg %p1953_p6  ;;  %p1960_p13 = por %p1959_p12, %p1958_p11 }
  0xba   : > { %p1961_p4 = pnand %p1960_p13, %p1954_p3 }
  0xbc   : > { %1964 = shalt.err (!%p1961_p4)
}
  0xbd   : > { %s2711_s5 = smov 8   ;;  %s2712_s2 = smov 128  }
  0xbe   : > { %1693 = dma.hbm_to_vmem [thread:$0]  (!%p2424_p1), %s2431_s18, 256, %s2418_s25, %s2433_s8, %s2712_s2, %s2712_s2, %s2711_s5  }
  0xbf   : > { %s76_s23 = sadd.s32 1, %s2101_s29  ;;  %p83_p2 = scmp.ne.s32.totalorder %s2101_s29, %s2097_s28 }
  0xc0   : > { %p2713_p11 = scmp.eq.s32.totalorder %s2407_s22, 0  ;;  %p2714_p3 = scmp.eq.s32.totalorder %s2133_s15, 0 }
  0xc1   : > { %s348_s6 = sand.u32 1, %s2133_s15   ;;  %s350_s21 = sand.u32 1, %s2101_s29  }
  0xc2   : > { %s2470_s7 = scalar_select %p2713_p11, %s2101_s29, %s76_s23  }
  0xc3   : > { %p85_p7 = por %p83_p2, %p2714_p3  ;;  %s1264_s20 = sshll.u32 %s350_s21, 4 }
  0xc4   : > { %s1284_s3 = sshll.u32 %s2129_s14, 8  ;;  %s352_s25 = scalar_lea.vmem [#allocation7], %s1264_s20 }
  0xc5   : > { %s2480_s0 = scalar_lea.hbm %s2661_s1, %s1284_s3  ;;  %s359_s18 = sshll.u32 %s352_s25, 4  ;;  %s2488_s18 = int_to_ptr.vmem [resolvable:$true] %s359_s18 }
  0xc6   : > { %p2715_p1 = scmp.lt.s32.totalorder %s2133_s15, 4  ;;  %s2490_s8 = scalar_lea.sflag [#allocation8], %s348_s6 }
  0xc7   : > { %s1965_s23 = scalar_lea.hbm %s2480_s0, 256  ;;  %s1970_s3 = scalar_lea.hbm %s2661_s1, 512 }
  0xc8   : > { %p2484_p5 = pnand %p2715_p1, %p85_p7  ;;  %p1966_p9 = scmp.ne.s32.totalorder %s2480_s0, %s1965_s23 }
  0xc9   : > { %p1971_p12 = scmp.lt.u32.totalorder %s2480_s0, %s2661_s1  ;;  %p1972_p13 = scmp.lt.u32.totalorder %s1970_s3, %s1965_s23 }
  0xca   : > { %p1967_p10 = pneg %p2484_p5  ;;  %p1974_p2 = scmp.lt.u32.totalorder %s1965_s23, %s2480_s0 }
  0xcb   : > { %p1973_p4 = por %p1972_p13, %p1971_p12 }
  0xcc   : > { %p1968_p8 = pnand %p1967_p10, %p1966_p9 }
  0xcd   : > { %p1975_p11 = por %p1974_p2, %p1973_p4 }
  0xce   : > { %p1969_p6 = pneg %p1968_p8 }
  0xd0   : > { %p1976_p3 = pnand %p1975_p11, %p1969_p6 }
  0xd2   : > { %1979 = shalt.err (!%p1976_p3)
}
  0xd3   : > { %s1980_s6 = scalar_lea.vmem %s2488_s18, 256  ;;  %s2142_s25 = smov [#allocation7]  }
  0xd4   : > { %p1981_p7 = scmp.ne.s32.totalorder %s2488_s18, %s1980_s6  ;;  %s1985_s21 = sshll.u32 %s2142_s25, 4  ;;  %s1986_s21 = int_to_ptr.vmem [resolvable:$false] %s1985_s21 }
  0xd5   : > { %s1987_s20 = scalar_lea.vmem %s1986_s21, 512  ;;  %p1988_p8 = scmp.lt.s32.totalorder %s2488_s18, %s1986_s21 }
  0xd6   : > { %p1983_p1 = pnand %p1981_p7, %p1967_p10  ;;  %p1989_p12 = scmp.lt.s32.totalorder %s1987_s20, %s1980_s6 }
  0xd8   : > { %p1984_p9 = pneg %p1983_p1  ;;  %p1990_p13 = por %p1989_p12, %p1988_p8 }
  0xda   : > { %p1991_p4 = pnand %p1990_p13, %p1984_p9 }
  0xdc   : > { %1994 = shalt.err (!%p1991_p4)
}
  0xdd   : > { %1696 = dma.hbm_to_vmem [thread:$0]  (!%p2484_p5), %s2480_s0, 256, %s2488_s18, %s2490_s8, %s2712_s2, %s2712_s2, %s2711_s5  }
  0xde   : > { %s2717_s23 = sld [smem:[#allocation25_spill]] }
  0xe4   : > { %p2718_p10 = scmp.ne.s32.totalorder %s2717_s23, 0 }
  0xe5   : > { %s2524_s3 = sand.u32 (!%p2718_p10), 1, %s2109_s9  }
  0xe6   : > { %371 = sbr.rel (%p2718_p10) target bundleno = 2297 (0x8f9), region = 52  ;;  %s1268_s24 = sshll.u32 (!%p2718_p10), %s2524_s3, 4 }
  0xe7   : > { %s374_s26 = scalar_lea.sflag (!%p2718_p10), [#allocation5], %s2524_s3  ;;  %s2528_s6 = scalar_lea.vmem (!%p2718_p10), [#allocation4], %s1268_s24 }
  0xed   : > { %2068 = dma.done.wait (%p2397_p0), %s374_s26, 256  }
  0xee   : > { %2070 = vsyncadd (%p2397_p0), %s374_s26, 4294967040  ;;  %s2719_s0 = sld [smem:[#allocation24_spill]]  ;;  %s382_s5 = sand.u32 1, %s2245_s16  }
  0xef   : > { %s384_s2 = sand.u32 1, %s2097_s28   ;;  %s383_s22 = scalar_lea.sflag [#allocation8], %s382_s5 }
  0xf0   : > { %s1269_s18 = sshll.u32 %s384_s2, 4 }
  0xf1   : > { %s386_s8 = scalar_lea.vmem [#allocation7], %s1269_s18 }
  0xf4   : > { %p2720_p5 = scmp.ne.s32.totalorder %s2719_s0, 0 }
  0xf6   : > { %2072 = dma.done.wait (%p2720_p5), %s383_s22, 256  }
  0xf7   : > { %2074 = vsyncadd (%p2720_p5), %s383_s22, 4294967040  ;;  %p2721_p6 = scmp.eq.s32.totalorder %s2245_s16, 0 }
  0xf9   : > { %2076 = dma.done.wait (%p2721_p6), [#allocation8], 2048   ;;  %p2722_p2 = pmov %p2721_p6 }
  0xfb   : > { %2078 = vsyncadd (%p2722_p2), [#allocation8], 4294965248  ;;  %p2723_p0 = pmov %p2722_p2 }
  0xfd   : > { %2080 = dma.done.wait (%p2723_p0), [#allocation11], 4096   ;;  %p2724_p11 = pmov %p2723_p0 }
  0xfe   : > { %p2725_p3 = pmov %p2723_p0 }
  0xff   : > { %2082 = vsyncadd (%p2724_p11), [#allocation11], 4294963200 }
 0x100   : > { %2084 = dma.done.wait (%p2725_p3), [#allocation14], 2048   ;;  %p2726_p7 = pmov %p2723_p0 }
 0x101   : > { %s2727_s21 = sld [smem:[#allocation27_spill]]  ;;  %s2728_s26 = sld [smem:[#allocation28_spill]] }
 0x102   : > { %2086 = vsyncadd (%p2726_p7), [#allocation14], 4294965248  ;;  %s2562_s0 = scalar_lea.vmem [#allocation15], %s1268_s24  ;;  %s2729_s5 = sld [smem:[#allocation22_spill]] }
 0x107   : > { %v2555_v0 = vld [vmem:[%s2727_s21] sm:$0x1] }
 0x108   : > { %v2560_v1 = vld [vmem:[%s2728_s26] sm:$0x1]  ;;  %p1275_p1 = scmp.ne.s32.totalorder %s2729_s5, 0 }
 0x109   : > { %v448_v2 = vld [vmem:[%s386_s8] sm:$0xff] (!%p1275_p1)  ;;  %v449_v3 = vld [vmem:[%s386_s8 + $0x8] sm:$0xff] (!%p1275_p1)  ;;  %v474_v62 = vlaneseq (!%p1275_p1) }
 0x10a   : > { %447 = sbr.rel (%p1275_p1) target bundleno = 795 (0x31b), region = 80  ;;  %450 = vadd.xlane.f32.xlu0 (!%p1275_p1), %v448_v2  ;;  %v489_v4 = vld [vmem:[#allocation10] sm:$0xff] (!%p1275_p1)  ;;  %v490_v5 = vld [vmem:[#allocation10 + $0x8] sm:$0xff] (!%p1275_p1)  ;;  %v491_v9 = vld [vmem:[#allocation10 + $0x10] sm:$0xff] (!%p1275_p1) }
 0x10b   : > { %v582_v6 = vld [vmem:[#allocation12] sm:$0xff] (!%p1275_p1)  ;;  %v1519_v7 = vpack.c.bf16 (!%p1275_p1), %v490_v5, %v489_v4  ;;  %v583_v8 = vld [vmem:[#allocation12 + $0x8] sm:$0xff] (!%p1275_p1)  ;;  %v492_v10 = vld [vmem:[#allocation10 + $0x18] sm:$0xff] (!%p1275_p1)  ;;  %v475_v4 = vshrl.u32 (!%p1275_p1), %v474_v62, 7 }
 0x10c   : > { %v1551_v11 = vpack.c.bf16 (!%p1275_p1), %v583_v8, %v582_v6  ;;  %v1523_v12 = vpack.c.bf16 (!%p1275_p1), %v492_v10, %v491_v9  ;;  %v584_v13 = vld [vmem:[#allocation12 + $0x10] sm:$0xff] (!%p1275_p1)  ;;  %v585_v14 = vld [vmem:[#allocation12 + $0x18] sm:$0xff] (!%p1275_p1)  ;;  %v493_v24 = vld [vmem:[#allocation10 + $0x20] sm:$0xff] (!%p1275_p1) }
 0x10d   : > { %1520 = vmatprep.subr.bf16.mxu0 (!%p1275_p1), %v1519_v7  ;;  %v1555_v15 = vpack.c.bf16 (!%p1275_p1), %v585_v14, %v584_v13  ;;  %v494_v25 = vld [vmem:[#allocation10 + $0x28] sm:$0xff] (!%p1275_p1)  ;;  %v586_v26 = vld [vmem:[#allocation12 + $0x20] sm:$0xff] (!%p1275_p1)  ;;  %v495_v30 = vld [vmem:[#allocation10 + $0x30] sm:$0xff] (!%p1275_p1)  ;;  %v476_v6 = vsub.s32 (!%p1275_p1), 0, %v475_v4 }
 0x10e   : > { %452 = vadd.xlane.f32.xlu0 (!%p1275_p1), %v449_v3  ;;  %1552 = vmatprep.subr.bf16.mxu1 (!%p1275_p1), %v1551_v11  ;;  %v1527_v27 = vpack.c.bf16 (!%p1275_p1), %v494_v25, %v493_v24  ;;  %v587_v28 = vld [vmem:[#allocation12 + $0x28] sm:$0xff] (!%p1275_p1)  ;;  %v496_v31 = vld [vmem:[#allocation10 + $0x38] sm:$0xff] (!%p1275_p1)  ;;  %v588_v32 = vld [vmem:[#allocation12 + $0x30] sm:$0xff] (!%p1275_p1) }
 0x10f   : > { %1522 = vmatpush3.bf16.msra.mxu0 (!%p1275_p1), %v1519_v7  ;;  %1554 = vmatpush3.bf16.msra.mxu1 (!%p1275_p1), %v1551_v11  ;;  %v1559_v29 = vpack.c.bf16 (!%p1275_p1), %v587_v28, %v586_v26  ;;  %v1531_v33 = vpack.c.bf16 (!%p1275_p1), %v496_v31, %v495_v30  ;;  %v589_v34 = vld [vmem:[#allocation12 + $0x38] sm:$0xff] (!%p1275_p1)  ;;  %v497_v36 = vld [vmem:[#allocation10 + $0x40] sm:$0xff] (!%p1275_p1)  ;;  %v498_v37 = vld [vmem:[#allocation10 + $0x48] sm:$0xff] (!%p1275_p1)  ;;  %v477_v7 = vrot.slane (!%p1275_p1), %v2555_v0, %v476_v6 }
 0x110   : > { %1524 = vmatprep.subr.bf16.mxu0 (!%p1275_p1), %v1523_v12  ;;  %1556 = vmatprep.subr.bf16.mxu1 (!%p1275_p1), %v1555_v15  ;;  %v1563_v35 = vpack.c.bf16 (!%p1275_p1), %v589_v34, %v588_v32  ;;  %v590_v38 = vld [vmem:[#allocation12 + $0x40] sm:$0xff] (!%p1275_p1)  ;;  %v1535_v39 = vpack.c.bf16 (!%p1275_p1), %v498_v37, %v497_v36  ;;  %v591_v40 = vld [vmem:[#allocation12 + $0x48] sm:$0xff] (!%p1275_p1)  ;;  %v499_v42 = vld [vmem:[#allocation10 + $0x50] sm:$0xff] (!%p1275_p1)  ;;  %v485_v10 = vrot.slane (!%p1275_p1), %v2560_v1, %v476_v6 }
 0x111   : > { %v1567_v41 = vpack.c.bf16 %v591_v40, %v590_v38  ;;  %v500_v43 = vld [vmem:[#allocation10 + $0x58] sm:$0xff]  ;;  %v592_v44 = vld [vmem:[#allocation12 + $0x50] sm:$0xff]  ;;  %v501_v47 = vld [vmem:[#allocation10 + $0x60] sm:$0xff] }
 0x112   : > { %v1539_v45 = vpack.c.bf16 %v500_v43, %v499_v42  ;;  %v593_v46 = vld [vmem:[#allocation12 + $0x58] sm:$0xff]  ;;  %v502_v48 = vld [vmem:[#allocation10 + $0x68] sm:$0xff]  ;;  %v594_v50 = vld [vmem:[#allocation12 + $0x60] sm:$0xff] }
 0x113   : > { %1526 = vmatpush3.bf16.msra.mxu0 %v1523_v12  ;;  %1558 = vmatpush3.bf16.msra.mxu1 %v1555_v15  ;;  %v1571_v49 = vpack.c.bf16 %v593_v46, %v592_v44  ;;  %v595_v51 = vld [vmem:[#allocation12 + $0x68] sm:$0xff]  ;;  %v1543_v52 = vpack.c.bf16 %v502_v48, %v501_v47  ;;  %v503_v54 = vld [vmem:[#allocation10 + $0x70] sm:$0xff]  ;;  %v504_v55 = vld [vmem:[#allocation10 + $0x78] sm:$0xff] }
 0x114   : > { %1528 = vmatprep.subr.bf16.mxu0 %v1527_v27  ;;  %1560 = vmatprep.subr.bf16.mxu1 %v1559_v29  ;;  %v1575_v53 = vpack.c.bf16 %v595_v51, %v594_v50  ;;  %v1547_v56 = vpack.c.bf16 %v504_v55, %v503_v54  ;;  %v596_v57 = vld [vmem:[#allocation12 + $0x70] sm:$0xff]  ;;  %v597_v58 = vld [vmem:[#allocation12 + $0x78] sm:$0xff] }
 0x115   : > { %v1579_v59 = vpack.c.bf16 %v597_v58, %v596_v57 }
 0x117   : > { %1530 = vmatpush3.bf16.msra.mxu0 %v1527_v27  ;;  %1562 = vmatpush3.bf16.msra.mxu1 %v1559_v29 }
 0x118   : > { %1532 = vmatprep.subr.bf16.mxu0 %v1531_v33  ;;  %1564 = vmatprep.subr.bf16.mxu1 %v1563_v35 }
 0x11b   : > { %1534 = vmatpush3.bf16.msra.mxu0 %v1531_v33  ;;  %1566 = vmatpush3.bf16.msra.mxu1 %v1563_v35 }
 0x11c   : > { %1536 = vmatprep.subr.bf16.mxu0 %v1535_v39  ;;  %1568 = vmatprep.subr.bf16.mxu1 %v1567_v41 }
 0x11f   : > { %1538 = vmatpush3.bf16.msra.mxu0 %v1535_v39  ;;  %1570 = vmatpush3.bf16.msra.mxu1 %v1567_v41 }
 0x120   : > { %1540 = vmatprep.subr.bf16.mxu0 %v1539_v45  ;;  %1572 = vmatprep.subr.bf16.mxu1 %v1571_v49 }
 0x123   : > { %1542 = vmatpush3.bf16.msra.mxu0 %v1539_v45  ;;  %1574 = vmatpush3.bf16.msra.mxu1 %v1571_v49 }
 0x124   : > { %1544 = vmatprep.subr.bf16.mxu0 %v1543_v52  ;;  %1576 = vmatprep.subr.bf16.mxu1 %v1575_v53 }
 0x127   : > { %1546 = vmatpush3.bf16.msra.mxu0 %v1543_v52  ;;  %1578 = vmatpush3.bf16.msra.mxu1 %v1575_v53 }
 0x128   : > { %1548 = vmatprep.subr.bf16.mxu0 %v1547_v56  ;;  %1580 = vmatprep.subr.bf16.mxu1 %v1579_v59 }
 0x12b   : > { %1550 = vmatpush3.bf16.msra.mxu0 %v1547_v56  ;;  %1582 = vmatpush3.bf16.msra.mxu1 %v1579_v59 }
 0x197   : > { %v451_v16 = vpop.xlane.xlu0 %450 }
 0x198   : > { %v455_v17 = vmul.f32 0.0078125, %v451_v16 }
 0x19a   : > { %v2565_v18 = vsub.f32 %v448_v2, %v455_v17 }
 0x19b   : > { %v453_v19 = vpop.xlane.xlu0 %452 }
 0x19c   : > { %v456_v20 = vmul.f32 0.0078125, %v453_v19  ;;  %v459_v21 = vmul.f32 %v2565_v18, %v2565_v18 }
 0x19e   : > { %v2569_v22 = vsub.f32 %v449_v3, %v456_v20  ;;  %461 = vadd.xlane.f32.xlu1 %v459_v21 }
 0x1a0   : > { %v460_v23 = vmul.f32 %v2569_v22, %v2569_v22 }
 0x1a2   : > { %463 = vadd.xlane.f32.xlu1 %v460_v23 }
 0x22b   : > { %v462_v60 = vpop.xlane.xlu1 %461 }
 0x22c   : > { %v465_v61 = vmul.f32 0.0078125, %v462_v60 }
 0x22e   : > { %v467_v63 = vadd.f32 1e-05, %v465_v61 }
 0x22f   : > { %v464_v2 = vpop.xlane.xlu1 %463 }
 0x230   : > { %1807 = vrsqrt.f32 %v467_v63  ;;  %v466_v3 = vmul.f32 0.0078125, %v464_v2 }
 0x232   : > { %v468_v5 = vadd.f32 1e-05, %v466_v3 }
 0x234   : > { %1809 = vrsqrt.f32 %v468_v5 }
 0x23a   : > { %v1808_v8 = vpop.eup %1807 }
 0x23b   : > { %v471_v9 = vmul.f32 %v1808_v8, %v2565_v18 }
 0x23d   : > { %v479_v11 = vmul.f32 %v477_v7, %v471_v9 }
 0x23e   : > { %v1810_v12 = vpop.eup %1809 }
 0x23f   : > { %v487_v13 = vadd.f32 %v485_v10, %v479_v11  ;;  %v472_v14 = vmul.f32 %v1810_v12, %v2569_v22 }
 0x241   : > { %1397 = vmatprep.mubr.f32.mxu0 %v487_v13  ;;  %1432 = vmatprep.mubr.f32.mxu1 %v487_v13  ;;  %v480_v15 = vmul.f32 %v477_v7, %v472_v14 }
 0x243   : > { %v488_v16 = vadd.f32 %v485_v10, %v480_v15 }
 0x245   : > { %1398 = vmatmul.mubr.f32.vlgmr.msra.gmra.mrb[0].mxu0 %v488_v16  ;;  %1433 = vmatmul.mubr.f32.vlgmr.msra.gmra.mrb[0].mxu1 %v488_v16 }
 0x318   : > { %v1399_v17 = vpop.f32.mrb[0].mxu0  ;;  %v1434_v19 = vpop.f32.mrb[0].mxu1 }
 0x319   : > { %581 = vst [vmem:[#allocation2 + $0x8] sm:$0xff] %v1399_v17  ;;  %674 = vst [vmem:[#allocation3 + $0x8] sm:$0xff] %v1434_v19  ;;  %v571_v20 = vpop.f32.mrb[1].mxu0  ;;  %v664_v21 = vpop.f32.mrb[1].mxu1 }
 0x31a   : > { %580 = vst [vmem:[#allocation2] sm:$0xff] %v571_v20  ;;  %673 = vst [vmem:[#allocation3] sm:$0xff] %v664_v21 }
 0x31b PF: > { %v675_v18 = vld [vmem:[%s2528_s6] sm:$0xff]  ;;  %v676_v22 = vld [vmem:[%s2528_s6 + $0x8] sm:$0xff]  ;;  %v701_v60 = vlaneseq  ;;  %vm888_vm0 = vcmask 130048   ;;  %s2730_s16 = sld [smem:[#allocation22_spill]]  ;;  %s2731_s24 = sld [smem:[#allocation23_spill]] }
 0x31c   : > { %677 = vadd.xlane.f32.xlu0 %v675_v18  ;;  %v716_v23 = vld [vmem:[#allocation9] sm:$0xff]  ;;  %v717_v24 = vld [vmem:[#allocation9 + $0x8] sm:$0xff]  ;;  %v718_v25 = vld [vmem:[#allocation9 + $0x10] sm:$0xff]  ;;  %s1101_s8 = sshll.u32 %s2562_s0, 4  ;;  %s2732_s21 = sld [smem:[#allocation33_spill]]  ;;  %s2595_s8 = int_to_ptr.vmem [resolvable:$true] %s1101_s8 }
 0x31d   : > { %v1583_v26 = vpack.c.bf16 %v717_v24, %v716_v23  ;;  %v719_v27 = vld [vmem:[#allocation9 + $0x18] sm:$0xff]  ;;  %v720_v37 = vld [vmem:[#allocation9 + $0x20] sm:$0xff]  ;;  %v721_v38 = vld [vmem:[#allocation9 + $0x28] sm:$0xff]  ;;  %v702_v2 = vshrl.u32 %v701_v60, 7  ;;  %s1086_s23 = scalar_lea.sflag [#allocation6], %s2524_s3  ;;  %s1995_s26 = scalar_lea.vmem %s2595_s8, 256 }
 0x31e   : > { %v1587_v28 = vpack.c.bf16 %v719_v27, %v718_v25  ;;  %v1591_v39 = vpack.c.bf16 %v721_v38, %v720_v37  ;;  %v722_v40 = vld [vmem:[#allocation9 + $0x30] sm:$0xff]  ;;  %v723_v41 = vld [vmem:[#allocation9 + $0x38] sm:$0xff]  ;;  %v724_v43 = vld [vmem:[#allocation9 + $0x40] sm:$0xff]  ;;  %p1996_p9 = scmp.ne.s32.totalorder %s2595_s8, %s1995_s26  ;;  %p2733_p8 = scmp.ne.s32.totalorder %s2705_s11, 0 }
 0x31f   : > { %1584 = vmatprep.subr.bf16.mxu0 %v1583_v26  ;;  %v1595_v42 = vpack.c.bf16 %v723_v41, %v722_v40  ;;  %v725_v44 = vld [vmem:[#allocation9 + $0x48] sm:$0xff]  ;;  %v726_v46 = vld [vmem:[#allocation9 + $0x50] sm:$0xff]  ;;  %v727_v47 = vld [vmem:[#allocation9 + $0x58] sm:$0xff]  ;;  %v703_v4 = vsub.s32 0, %v702_v2  ;;  %s2143_s5 = smov [#allocation15]  }
 0x320   : > { %679 = vadd.xlane.f32.xlu0 %v676_v22  ;;  %1586 = vmatpush3.bf16.msra.mxu0 %v1583_v26  ;;  %v1599_v45 = vpack.c.bf16 %v725_v44, %v724_v43  ;;  %v728_v48 = vld [vmem:[#allocation9 + $0x60] sm:$0xff]  ;;  %v1603_v49 = vpack.c.bf16 %v727_v47, %v726_v46  ;;  %v729_v50 = vld [vmem:[#allocation9 + $0x68] sm:$0xff]  ;;  %v730_v52 = vld [vmem:[#allocation9 + $0x70] sm:$0xff]  ;;  %p1997_p12 = pnand %p1996_p9, %p2733_p8 }
 0x321   : > { %1588 = vmatprep.subr.bf16.mxu0 %v1587_v28  ;;  %v1607_v51 = vpack.c.bf16 %v729_v50, %v728_v48  ;;  %v731_v53 = vld [vmem:[#allocation9 + $0x78] sm:$0xff]  ;;  %v809_v55 = vld [vmem:[#allocation2] sm:$0xff]  ;;  %v810_v56 = vld [vmem:[#allocation2 + $0x8] sm:$0xff]  ;;  %v704_v5 = vrot.slane %v2555_v0, %v703_v4  ;;  %v712_v8 = vrot.slane %v2560_v1, %v703_v4  ;;  %s1279_s6 = sshll.u32 %s2730_s16, 1  ;;  %s1280_s2 = sshll.u32 %s2731_s24, 2 }
 0x322   : > { %v1611_v54 = vpack.c.bf16 %v731_v53, %v730_v52  ;;  %v1615_v57 = vpack.c.bf16 %v810_v56, %v809_v55  ;;  %v994_v40 = vld [vmem:[#allocation13 + $0x10] sm:$0xff]  ;;  %v995_v41 = vld [vmem:[#allocation13 + $0x18] sm:$0xff]  ;;  %v996_v46 = vld [vmem:[#allocation13 + $0x20] sm:$0xff]  ;;  %s1098_s18 = sadd.s32 %s1280_s2, %s1279_s6  ;;  %p1998_p13 = pneg %p1997_p12 }
 0x323   : > { %v997_v47 = vld [vmem:[#allocation13 + $0x28] sm:$0xff]  ;;  %v999_v50 = vld [vmem:[#allocation13 + $0x38] sm:$0xff]  ;;  %v1000_v52 = vld [vmem:[#allocation13 + $0x40] sm:$0xff]  ;;  %s1281_s22 = sshll.u32 %s1098_s18, 7  ;;  %s1999_s16 = sshll.u32 %s2143_s5, 4  ;;  %s2000_s16 = int_to_ptr.vmem [resolvable:$false] %s1999_s16 }
 0x324   : > { %1590 = vmatpush3.bf16.msra.mxu0 %v1587_v28  ;;  %v1631_v48 = vpack.c.bf16 %v997_v47, %v996_v46  ;;  %v1001_v53 = vld [vmem:[#allocation13 + $0x48] sm:$0xff]  ;;  %v1002_v55 = vld [vmem:[#allocation13 + $0x50] sm:$0xff]  ;;  %v1003_v56 = vld [vmem:[#allocation13 + $0x58] sm:$0xff]  ;;  %s2593_s20 = scalar_lea.hbm %s2732_s21, %s1281_s22  ;;  %s2001_s24 = scalar_lea.vmem %s2000_s16, 512 }
 0x325   : > { %1592 = vmatprep.subr.bf16.mxu0 %v1591_v39  ;;  %p2002_p4 = scmp.lt.s32.totalorder %s2595_s8, %s2000_s16  ;;  %p2003_p10 = scmp.lt.s32.totalorder %s2001_s24, %s1995_s26 }
 0x327   : > { %p2004_p5 = por %p2003_p10, %p2002_p4 }
 0x328   : > { %1594 = vmatpush3.bf16.msra.mxu0 %v1591_v39 }
 0x329   : > { %1596 = vmatprep.subr.bf16.mxu0 %v1595_v42  ;;  %p2005_p6 = pnand %p2004_p5, %p1998_p13 }
 0x32c   : > { %1598 = vmatpush3.bf16.msra.mxu0 %v1595_v42 }
 0x32d   : > { %1600 = vmatprep.subr.bf16.mxu0 %v1599_v45 }
 0x330   : > { %1602 = vmatpush3.bf16.msra.mxu0 %v1599_v45  ;;  %v1627_v45 = vpack.c.bf16 %v995_v41, %v994_v40 }
 0x331   : > { %1604 = vmatprep.subr.bf16.mxu0 %v1603_v49 }
 0x334   : > { %1606 = vmatpush3.bf16.msra.mxu0 %v1603_v49  ;;  %v998_v49 = vld [vmem:[#allocation13 + $0x30] sm:$0xff] }
 0x335   : > { %1608 = vmatprep.subr.bf16.mxu0 %v1607_v51 }
 0x338   : > { %1610 = vmatpush3.bf16.msra.mxu0 %v1607_v51  ;;  %v1635_v51 = vpack.c.bf16 %v999_v50, %v998_v49 }
 0x339   : > { %1612 = vmatprep.subr.bf16.mxu0 %v1611_v54 }
 0x33c   : > { %1614 = vmatpush3.bf16.msra.mxu0 %v1611_v54  ;;  %v1639_v54 = vpack.c.bf16 %v1001_v53, %v1000_v52 }
 0x33d   : > { %1616 = vmatprep.subr.bf16.mxu0 %v1615_v57 }
 0x3a9   : > { %v678_v29 = vpop.xlane.xlu0 %677 }
 0x3aa   : > { %v682_v30 = vmul.f32 0.0078125, %v678_v29 }
 0x3ac   : > { %v684_v31 = vsub.f32 %v675_v18, %v682_v30 }
 0x3ad   : > { %v680_v32 = vpop.xlane.xlu0 %679 }
 0x3ae   : > { %v683_v33 = vmul.f32 0.0078125, %v680_v32  ;;  %v686_v34 = vmul.f32 %v684_v31, %v684_v31  ;;  %v812_v32 = vld [vmem:[#allocation3 + $0x8] sm:$0xff] }
 0x3b0   : > { %v685_v35 = vsub.f32 %v676_v22, %v683_v33  ;;  %688 = vadd.xlane.f32.xlu1 %v686_v34  ;;  %v992_v34 = vld [vmem:[#allocation13] sm:$0xff] }
 0x3b2   : > { %v687_v36 = vmul.f32 %v685_v35, %v685_v35 }
 0x3b4   : > { %690 = vadd.xlane.f32.xlu1 %v687_v36 }
 0x43d   : > { %v689_v58 = vpop.xlane.xlu1 %688 }
 0x43e   : > { %v692_v59 = vmul.f32 0.0078125, %v689_v58  ;;  %v1004_v58 = vld [vmem:[#allocation13 + $0x60] sm:$0xff] }
 0x440   : > { %v694_v61 = vadd.f32 1e-05, %v692_v59  ;;  %v1005_v59 = vld [vmem:[#allocation13 + $0x68] sm:$0xff] }
 0x441   : > { %v691_v62 = vpop.xlane.xlu1 %690  ;;  %v1647_v60 = vpack.c.bf16 %v1005_v59, %v1004_v58 }
 0x442   : > { %1811 = vrsqrt.f32 %v694_v61  ;;  %v693_v63 = vmul.f32 0.0078125, %v691_v62  ;;  %v1006_v61 = vld [vmem:[#allocation13 + $0x70] sm:$0xff]  ;;  %v1007_v62 = vld [vmem:[#allocation13 + $0x78] sm:$0xff] }
 0x444   : > { %v695_v3 = vadd.f32 1e-05, %v693_v63  ;;  %v1651_v63 = vpack.c.bf16 %v1007_v62, %v1006_v61 }
 0x446   : > { %1813 = vrsqrt.f32 %v695_v3 }
 0x44c   : > { %v1812_v6 = vpop.eup %1811 }
 0x44d   : > { %v698_v7 = vmul.f32 %v1812_v6, %v684_v31  ;;  %v811_v31 = vld [vmem:[#allocation3] sm:$0xff] }
 0x44e   : > { %v1619_v33 = vpack.c.bf16 %v812_v32, %v811_v31 }
 0x44f   : > { %v706_v9 = vmul.f32 %v704_v5, %v698_v7 }
 0x450   : > { %v1814_v10 = vpop.eup %1813  ;;  %1620 = vmatprep.subr.bf16.mxu1 %v1619_v33 }
 0x451   : > { %v714_v11 = vadd.f32 %v712_v8, %v706_v9  ;;  %v699_v12 = vmul.f32 %v1814_v10, %v685_v35  ;;  %1622 = vmatpush3.bf16.msra.mxu1 %v1619_v33  ;;  %v993_v35 = vld [vmem:[#allocation13 + $0x8] sm:$0xff] }
 0x452   : > { %v1623_v36 = vpack.c.bf16 %v993_v35, %v992_v34 }
 0x453   : > { %1467 = vmatprep.mubr.f32.mxu0 %v714_v11  ;;  %v707_v13 = vmul.f32 %v704_v5, %v699_v12 }
 0x454   : > { %1624 = vmatprep.subr.bf16.mxu1 %v1623_v36 }
 0x455   : > { %v715_v14 = vadd.f32 %v712_v8, %v707_v13 }
 0x457   : > { %1468 = vmatmul.mubr.f32.vlgmr.msra.gmra.mrb[0].mxu0 %v715_v14 }
 0x458   : > { %1618 = vmatpush3.bf16.xpose.msra.mxu0 %v1615_v57  ;;  %v1643_v57 = vpack.c.bf16 %v1003_v56, %v1002_v55 }
 0x52a   : > { %v1469_v15 = vpop.f32.mrb[0].mxu0 }
 0x52b   : > { %v798_v16 = vpop.f32.mrb[1].mxu0  ;;  %v808_v19 = vmul.f32 0.088388346, %v1469_v15 }
 0x52c   : > { %v807_v17 = vmul.f32 0.088388346, %v798_v16 }
 0x52e   : > { %1474 = vmatprep.mubr.f32.mxu0 %v807_v17 }
 0x52f   : > { %1475 = vmatmul.mubr.f32.vlgmr.msra.gmra.mrb[2].mxu0 %v808_v19 }
 0x602   : > { %v1476_v0 = vpop.f32.mrb[2].mxu0 }
 0x603   : > { %v879_v20 = vpop.f32.mrb[3].mxu0  ;;  %v892_v1 = vsel %vm888_vm0, %v1476_v0, -inf }
 0x604   : > { %893 = vmax.xlane.f32.xlu1 %v892_v1  ;;  %v889_v21 = vsel %vm888_vm0, %v879_v20, -inf }
 0x605   : > { %890 = vmax.xlane.f32.xlu0 %v889_v21 }
 0x691   : > { %v894_v18 = vpop.xlane.xlu1 %893 }
 0x692   : > { %v896_v22 = vsub.f32 %v1476_v0, %v894_v18  ;;  %v891_v23 = vpop.xlane.xlu0 %890 }
 0x693   : > { %v895_v24 = vsub.f32 %v879_v20, %v891_v23 }
 0x694   : > { %v899_v25 = vmul.f32 1.442695, %v896_v22 }
 0x695   : > { %v897_v26 = vmul.f32 1.442695, %v895_v24 }
 0x696   : > { %1815 = vpow2.f32 %v899_v25 }
 0x697   : > { %1817 = vpow2.f32 %v897_v26 }
 0x6a0   : > { %v1816_v27 = vpop.eup %1815 }
 0x6a1   : > { %v1818_v28 = vpop.eup %1817  ;;  %v904_v29 = vsel %vm888_vm0, %v1816_v27, 0.0 }
 0x6a2   : > { %905 = vadd.xlane.f32.xlu1 %v904_v29  ;;  %v901_v30 = vsel %vm888_vm0, %v1818_v28, 0.0 }
 0x6a3   : > { %902 = vadd.xlane.f32.xlu0 %v901_v30 }
 0x72f   : > { %v906_v37 = vpop.xlane.xlu1 %905 }
 0x730   : > { %1819 = vrcp.f32 %v906_v37  ;;  %v903_v38 = vpop.xlane.xlu0 %902 }
 0x731   : > { %1821 = vrcp.f32 %v903_v38 }
 0x73a   : > { %v1820_v39 = vpop.eup %1819 }
 0x73b   : > { %v1822_v42 = vpop.eup %1821  ;;  %v910_v44 = vmul.f32 %v1820_v39, %v1816_v27 }
 0x73c   : > { %v909_v43 = vmul.f32 %v1822_v42, %v1818_v28 }
 0x73e   : > { %1481 = vmatprep.mubr.msk.f32.mxu1 %vm888_vm0, %v909_v43 }
 0x73f   : > { %1482 = vmatmul.mubr.msk.f32.vlgmr.msra.gmra.mrb[0].mxu1 %vm888_vm0, %v910_v44 }
 0x740   : > { %1626 = vmatpush3.bf16.msra.mxu1 %v1623_v36 }
 0x741   : > { %1628 = vmatprep.subr.bf16.mxu1 %v1627_v45 }
 0x744   : > { %1630 = vmatpush3.bf16.msra.mxu1 %v1627_v45 }
 0x745   : > { %1632 = vmatprep.subr.bf16.mxu1 %v1631_v48 }
 0x748   : > { %1634 = vmatpush3.bf16.msra.mxu1 %v1631_v48 }
 0x749   : > { %1636 = vmatprep.subr.bf16.mxu1 %v1635_v51 }
 0x74c   : > { %1638 = vmatpush3.bf16.msra.mxu1 %v1635_v51 }
 0x74d   : > { %1640 = vmatprep.subr.bf16.mxu1 %v1639_v54 }
 0x750   : > { %1642 = vmatpush3.bf16.msra.mxu1 %v1639_v54 }
 0x751   : > { %1644 = vmatprep.subr.bf16.mxu1 %v1643_v57 }
 0x754   : > { %1646 = vmatpush3.bf16.msra.mxu1 %v1643_v57 }
 0x755   : > { %1648 = vmatprep.subr.bf16.mxu1 %v1647_v60 }
 0x758   : > { %1650 = vmatpush3.bf16.msra.mxu1 %v1647_v60 }
 0x759   : > { %1652 = vmatprep.subr.bf16.mxu1 %v1651_v63 }
 0x75c   : > { %1654 = vmatpush3.bf16.msra.mxu1 %v1651_v63 }
 0x812   : > { %v1483_v2 = vpop.f32.mrb[0].mxu1 }
 0x813   : > { %v983_v3 = vpop.f32.mrb[1].mxu1 }
 0x814   : > { %1516 = vmatprep.mubr.f32.mxu1 %v983_v3 }
 0x815   : > { %1517 = vmatmul.mubr.f32.vlgmr.msra.gmra.mrb[2].mxu1 %v1483_v2 }
 0x8e8   : > { %v1518_v4 = vpop.f32.mrb[2].mxu1 }
 0x8e9   : > { %1084 = vst [vmem:[%s2562_s0 + $0x8] sm:$0xff] %v1518_v4  ;;  %v1074_v5 = vpop.f32.mrb[3].mxu1 }
 0x8ea   : > { %1083 = vst [vmem:[%s2562_s0] sm:$0xff] %v1074_v5 }
 0x8eb   : > { %2008 = shalt.err (!%p2005_p6)
}
 0x8ec   : > { %s2009_s0 = scalar_lea.hbm %s2593_s20, 256  ;;  %s2013_s18 = scalar_lea.hbm %s2732_s21, 1024 }
 0x8ed   : > { %p2010_p2 = scmp.ne.s32.totalorder %s2593_s20, %s2009_s0  ;;  %p2014_p3 = scmp.lt.u32.totalorder %s2593_s20, %s2732_s21 }
 0x8ee   : > { %p2015_p7 = scmp.lt.u32.totalorder %s2013_s18, %s2009_s0  ;;  %p2017_p9 = scmp.lt.u32.totalorder %s2009_s0, %s2593_s20 }
 0x8ef   : > { %p2011_p0 = pnand %p2010_p2, %p2733_p8 }
 0x8f0   : > { %p2016_p1 = por %p2015_p7, %p2014_p3 }
 0x8f1   : > { %p2012_p11 = pneg %p2011_p0 }
 0x8f2   : > { %p2018_p12 = por %p2017_p9, %p2016_p1 }
 0x8f4   : > { %p2019_p13 = pnand %p2018_p12, %p2012_p11 }
 0x8f6   : > { %2022 = shalt.err (!%p2019_p13)
}
 0x8f7   : > { %s2144_s25 = smov 128   ;;  %s2145_s26 = smov 8  }
 0x8f8   : > { %1675 = dma.vmem_to_hbm [thread:$0]  (%p2733_p8), %s2595_s8, 256, %s2593_s20, %s1086_s23, %s2144_s25, %s2144_s25, %s2145_s26  }
 0x8f9 PF: > { %p1710_p4 = scmp.ge.s32.totalorder %s2133_s15, 2  ;;  %s1116_s5 = sand.u32 1, %s2105_s30  }
 0x8fa   : > { %p2734_p10 = scmp.ne.s32.totalorder %s2708_s27, 0  ;;  %s1117_s16 = scalar_lea.sflag [#allocation6], %s1116_s5 }
 0x8fc   : > { %p1698_p5 = pnand %p1710_p4, %p2734_p10 }
 0x8fe   : > { %2088 = dma.done.wait (!%p1698_p5), %s1117_s16, 256  }
 0x8ff   : > { %2090 = vsyncadd (!%p1698_p5), %s1117_s16, 4294967040  ;;  %s29_s15 = sadd.s32 1, %s2133_s15   ;;  %s2735_s27 = smov %s2097_s28 }
 0x900   : > { %p26_p6 = scmp.ge.s32.totalorder %s29_s15, 6   ;;  %s2736_s28 = smov %s2101_s29 }
 0x901   : > { %s2737_s29 = smov %s2470_s7  ;;  %s2738_s30 = smov %s2109_s9 }
 0x902   : > { %s2739_s9 = smov %s2113_s10  ;;  %s2740_s10 = smov %s2414_s17 }
 0x903   : > { %s2741_s11 = smov %s2125_s13  ;;  %s2742_s12 = smov %s2129_s14 }
 0x904   : > { %s2743_s13 = smov %s2746_s19  ;;  %s2744_s14 = smov %s2750_s4 }
 0x905   :  { %28 = sbr.rel (!%p26_p6) target bundleno = 22 (0x16), region = 130 }
 0x90c   :  { %1122 = vsyncpa [#allocation5], 1 }
 0x90d   :  { %1124 = vsyncpa [#allocation5 + $0x1], 1 }
 0x90e   :  { %1125 = vsyncpa [#allocation8], 1 }
 0x90f   :  { %1127 = vsyncpa [#allocation8 + $0x1], 1 }
 0x910   :  { %1128 = vsyncpa [#allocation11], 1 }
 0x911   :  { %1129 = vsyncpa [#allocation14], 1 }
 0x912   :  { %1130 = vsyncpa [#allocation6], 1 }
 0x913   :  { %1132 = vsyncpa [#allocation6 + $0x1], 1 }

</bundles_post_ra>
